<compile_context>
chip_gen: v5e
topology: v5e:2x2
jax: 0.10.0
libtpu: 0.0.40
codegen_flags: <defaults>
</compile_context>

<pallas_src>
import functools

import jax
import jax.numpy as jnp
from jax.experimental import pallas as pl
from jax.experimental.pallas import tpu as pltpu

TN = 256  # rows per grid step


# ----------------------------- Pallas kernel ------------------------------

def _voxel_kernel(half, tn, flat_ref, xyz_ref, vox_ref, out_ref, gbuf, sem):
    """One tile of `tn` rows.

    flat_ref : (Npad,)  int32  SMEM  scalar-prefetched flat voxel indices
    xyz_ref  : (tn, 3)  f32    VMEM  sample positions (for the box test)
    vox_ref  : (V^3, 4) f32    HBM   flattened voxel table (DMA-gathered)
    out_ref  : (tn, 4)  f32    VMEM  packed output: lanes 0..2 rgb, lane 3 sigma
    gbuf     : (tn, 4)  f32    VMEM  gather landing buffer
    sem      :                 DMA semaphore shared by all row copies
    """
    base = pl.program_id(0) * tn

    # ---- DMA gather: issue all row copies, then wait for all of them ----
    @pl.loop(0, tn)
    def _issue(r):
        idx = flat_ref[base + r]
        pltpu.make_async_copy(vox_ref.at[pl.ds(idx, 1)],
                              gbuf.at[pl.ds(r, 1)], sem).start()

    @pl.loop(0, tn)
    def _wait(r):
        # every copy has identical shape; one wait per issued copy
        pltpu.make_async_copy(vox_ref.at[pl.ds(0, 1)],
                              gbuf.at[pl.ds(0, 1)], sem).wait()

    # ---- elementwise epilogue (VPU/EUP) ----
    xyz = xyz_ref[...]
    inside = ((jnp.abs(xyz[:, 0:1]) < half)
              & (jnp.abs(xyz[:, 1:2]) < half)
              & (jnp.abs(xyz[:, 2:3]) < half))                 # (tn, 1) bool

    cd = jnp.where(inside, gbuf[...], 0.0)                      # (tn, 4)
    lane = jax.lax.broadcasted_iota(jnp.int32, cd.shape, 1)
    out_ref[...] = jnp.where(lane < 3,
                             jax.nn.sigmoid(cd),                # rgb lanes 0..2
                             jnp.maximum(cd, 0.0))              # sigma lane 3


# --------------------------------- glue ------------------------------------

def voxel_forward(xyz, d, voxels, scale=1.0, tn=TN):
    """Pallas implementation of Voxel.forward.  `d` is unused by the module."""
    del d
    nb = voxels.shape[0]
    n = xyz.shape[0]

    # TODO(synk): the float->int voxel-index math stays in plain JAX because
    # the gather DMA needs scalar (SMEM) addresses and there is no clean
    # in-kernel vector->SMEM path for per-row computed indices.
    ind = (xyz / (scale / nb) + nb / 2.0).astype(jnp.int32)   # trunc toward 0,
    ind = jnp.clip(ind, 0, nb - 1)                            # like torch .long()
    flat = ((ind[:, 0] * nb + ind[:, 1]) * nb + ind[:, 2]).astype(jnp.int32)

    npad = pl.cdiv(n, tn) * tn
    if npad != n:
        xyz = jnp.pad(xyz, ((0, npad - n), (0, 0)))
        flat = jnp.pad(flat, (0, npad - n))

    vox_flat = voxels.reshape(-1, 4)

    kernel = functools.partial(_voxel_kernel, float(scale) * 0.5, tn)

    out = pl.pallas_call(
        kernel,
        out_shape=jax.ShapeDtypeStruct((npad, 4), jnp.float32),
        grid_spec=pltpu.PrefetchScalarGridSpec(
            num_scalar_prefetch=1,                 # flat indices -> SMEM
            grid=(npad // tn,),
            in_specs=[
                pl.BlockSpec((tn, 3), lambda i, flat_idx: (i, 0)),  # xyz tile
                pl.BlockSpec(memory_space=pl.ANY),                  # voxel table (HBM)
            ],
            out_specs=pl.BlockSpec((tn, 4), lambda i, flat_idx: (i, 0)),
            scratch_shapes=[
                pltpu.VMEM((tn, 4), jnp.float32),   # gather landing buffer
                pltpu.SemaphoreType.DMA,            # shared DMA semaphore
            ],
        ),
        compiler_params=pltpu.CompilerParams(
            dimension_semantics=("parallel",)),
    )(flat, xyz, vox_flat)

    out = out[:n]
    return out[:, :3], out[:, 3:4]


def voxel_reference(xyz, d, voxels, scale=1.0):
    """Pure-JAX mirror of the PyTorch forward."""
    del d
    nb = voxels.shape[0]
    half = scale / 2.0
    cond = ((jnp.abs(xyz[:, 0]) < half)
            & (jnp.abs(xyz[:, 1]) < half)
            & (jnp.abs(xyz[:, 2]) < half))
    ind = jnp.clip((xyz / (scale / nb) + nb / 2.0).astype(jnp.int32), 0, nb - 1)
    vals = voxels[ind[:, 0], ind[:, 1], ind[:, 2], :]
    cd = jnp.where(cond[:, None], vals, 0.0)
    return jax.nn.sigmoid(cd[:, :3]), jnp.maximum(cd[:, 3:4], 0.0)


# --------------------------------- main -------------------------------------

if __name__ == "__main__":
    key = jax.random.PRNGKey(0)
    k_vox, k_xyz, k_dir = jax.random.split(key, 3)

    NB = 16       # small voxel grid for the example (module default is 100)
    SCALE = 1.0
    N = 500       # deliberately not a multiple of TN to exercise padding

    voxels = jax.random.uniform(k_vox, (NB, NB, NB, 4), jnp.float32)
    xyz = 0.5 * jax.random.normal(k_xyz, (N, 3), dtype=jnp.float32)  # in/out mix
    dirs = jax.random.normal(k_dir, (N, 3), dtype=jnp.float32)       # unused by module

    rgb, sigma = voxel_forward(xyz, dirs, voxels, scale=SCALE)
    rgb, sigma = jax.block_until_ready((rgb, sigma))

    rgb_ref, sigma_ref = voxel_reference(xyz, dirs, voxels, scale=SCALE)
    assert rgb.shape == (N, 3) and sigma.shape == (N, 1)
    assert jnp.allclose(rgb, rgb_ref, atol=1e-5, rtol=1e-5)
    assert jnp.allclose(sigma, sigma_ref, atol=1e-5, rtol=1e-5)

    print("KERNEL_OK")
</pallas_src>

<mosaic_0001>
module attributes {stable_mosaic.version = 11 : i64} {
  func.func @_voxel_kernel(%arg0: i32, %arg1: memref<512xi32, #tpu.memory_space<smem>>, %arg2: memref<256x3xf32, #tpu.memory_space<vmem>>, %arg3: memref<4096x4xf32, #tpu.memory_space<any>>, %arg4: memref<256x4xf32, #tpu.memory_space<vmem>>, %arg5: memref<256x4xf32, #tpu.memory_space<vmem>>, %arg6: memref<!tpu.dma_semaphore, #tpu.memory_space<semaphore_mem>>) attributes {dimension_semantics = [#tpu.dimension_semantics<parallel>], iteration_bounds = array<i64: 2>, scalar_prefetch = 1 : i64, scratch_operands = 2 : i64, tpu.core_type = #tpu.core_type<tc>, window_params = [{transform_indices = @transform_0, window_bounds = array<i64: 256, 3>}, {}, {transform_indices = @transform_2, window_bounds = array<i64: 256, 4>}]} {
    %c256_i32 = arith.constant 256 : i32
    %0 = arith.muli %arg0, %c256_i32 : i32
    %c0_i32 = arith.constant 0 : i32
    %c256_i32_0 = arith.constant 256 : i32
    %1 = arith.addi %c0_i32, %c256_i32_0 : i32
    %c1_i32 = arith.constant 1 : i32
    scf.for %arg7 = %c0_i32 to %1 step %c1_i32  : i32 {
      %c1_i32_15 = arith.constant 1 : i32
      %35 = arith.muli %arg7, %c1_i32_15 : i32
      %c0_i32_16 = arith.constant 0 : i32
      %36 = arith.addi %c0_i32_16, %35 : i32
      %37 = arith.addi %0, %36 : i32
      %38 = arith.index_cast %37 : i32 to index
      %39 = memref.load %arg1[%38] : memref<512xi32, #tpu.memory_space<smem>>
      %c0_i32_17 = arith.constant 0 : i32
      %40 = tpu.memref_slice %arg3[%39, %c0_i32_17] : memref<4096x4xf32, #tpu.memory_space<any>> -> memref<1x4xf32, #tpu.memory_space<any>>
      %c0_i32_18 = arith.constant 0 : i32
      %41 = tpu.memref_slice %arg5[%36, %c0_i32_18] : memref<256x4xf32, #tpu.memory_space<vmem>> -> memref<1x4xf32, #tpu.memory_space<vmem>>
      tpu.enqueue_dma source(%40 : memref<1x4xf32, #tpu.memory_space<any>>) target(%41 : memref<1x4xf32, #tpu.memory_space<vmem>>) target_semaphore(%arg6 : memref<!tpu.dma_semaphore, #tpu.memory_space<semaphore_mem>>)
    }
    %c256_i32_1 = arith.constant 256 : i32
    %c0_i32_2 = arith.constant 0 : i32
    %c256_i32_3 = arith.constant 256 : i32
    %2 = arith.addi %c0_i32_2, %c256_i32_3 : i32
    %c1_i32_4 = arith.constant 1 : i32
    scf.for %arg7 = %c0_i32_2 to %2 step %c1_i32_4  : i32 {
      %c0_i32_15 = arith.constant 0 : i32
      %c0_i32_16 = arith.constant 0 : i32
      %35 = tpu.memref_slice %arg3[%c0_i32_15, %c0_i32_16] : memref<4096x4xf32, #tpu.memory_space<any>> -> memref<1x4xf32, #tpu.memory_space<any>>
      %c0_i32_17 = arith.constant 0 : i32
      %c0_i32_18 = arith.constant 0 : i32
      %36 = tpu.memref_slice %arg5[%c0_i32_17, %c0_i32_18] : memref<256x4xf32, #tpu.memory_space<vmem>> -> memref<1x4xf32, #tpu.memory_space<vmem>>
      tpu.wait_dma2 semaphore(%arg6 : memref<!tpu.dma_semaphore, #tpu.memory_space<semaphore_mem>>) src(%35 : memref<1x4xf32, #tpu.memory_space<any>>) dst(%36 : memref<1x4xf32, #tpu.memory_space<vmem>>)
    }
    %c0 = arith.constant 0 : index
    %c0_5 = arith.constant 0 : index
    %3 = vector.load %arg2[%c0, %c0_5] : memref<256x3xf32, #tpu.memory_space<vmem>>, vector<256x3xf32>
    %4 = vector.extract_strided_slice %3 {offsets = [0, 0], sizes = [256, 1], strides = [1, 1]} : vector<256x3xf32> to vector<256x1xf32>
    %5 = math.absf %4 : vector<256x1xf32>
    %cst = arith.constant 5.000000e-01 : f32
    %6 = vector.broadcast %cst : f32 to vector<256x1xf32>
    %7 = arith.cmpf olt, %5, %6 : vector<256x1xf32>
    %8 = vector.extract_strided_slice %3 {offsets = [0, 1], sizes = [256, 1], strides = [1, 1]} : vector<256x3xf32> to vector<256x1xf32>
    %9 = math.absf %8 : vector<256x1xf32>
    %cst_6 = arith.constant 5.000000e-01 : f32
    %10 = vector.broadcast %cst_6 : f32 to vector<256x1xf32>
    %11 = arith.cmpf olt, %9, %10 : vector<256x1xf32>
    %12 = arith.andi %7, %11 : vector<256x1xi1>
    %13 = vector.extract_strided_slice %3 {offsets = [0, 2], sizes = [256, 1], strides = [1, 1]} : vector<256x3xf32> to vector<256x1xf32>
    %14 = math.absf %13 : vector<256x1xf32>
    %cst_7 = arith.constant 5.000000e-01 : f32
    %15 = vector.broadcast %cst_7 : f32 to vector<256x1xf32>
    %16 = arith.cmpf olt, %14, %15 : vector<256x1xf32>
    %17 = arith.andi %12, %16 : vector<256x1xi1>
    %c0_8 = arith.constant 0 : index
    %c0_9 = arith.constant 0 : index
    %18 = vector.load %arg5[%c0_8, %c0_9] : memref<256x4xf32, #tpu.memory_space<vmem>>, vector<256x4xf32>
    %cst_10 = arith.constant 0.000000e+00 : f32
    %19 = vector.shape_cast %17 : vector<256x1xi1> to vector<256x1xi1>
    %20 = vector.broadcast %19 : vector<256x1xi1> to vector<256x4xi1>
    %21 = vector.broadcast %cst_10 : f32 to vector<256x4xf32>
    %22 = arith.select %20, %18, %21 : vector<256x4xi1>, vector<256x4xf32>
    %23 = tpu.iota {dimensions = array<i32: 1>} : vector<256x4xi32>
    %c3_i32 = arith.constant 3 : i32
    %24 = vector.broadcast %c3_i32 : i32 to vector<256x4xi32>
    %25 = arith.cmpi slt, %23, %24 : vector<256x4xi32>
    %26 = arith.negf %22 : vector<256x4xf32>
    %27 = math.exp %26 : vector<256x4xf32>
    %cst_11 = arith.constant 1.000000e+00 : f32
    %28 = vector.broadcast %cst_11 : f32 to vector<256x4xf32>
    %29 = arith.addf %28, %27 : vector<256x4xf32>
    %30 = arith.divf %28, %29 : vector<256x4xf32>
    %cst_12 = arith.constant 0.000000e+00 : f32
    %31 = vector.broadcast %cst_12 : f32 to vector<256x4xf32>
    %32 = arith.maximumf %22, %31 : vector<256x4xf32>
    %33 = arith.select %25, %30, %32 : vector<256x4xi1>, vector<256x4xf32>
    %c0_13 = arith.constant 0 : index
    %c0_14 = arith.constant 0 : index
    %34 = vector.load %arg4[%c0_13, %c0_14] : memref<256x4xf32, #tpu.memory_space<vmem>>, vector<256x4xf32>
    tpu.vector_store %arg4[%c0_13, %c0_14], %33 {strides = array<i32>} : memref<256x4xf32, #tpu.memory_space<vmem>>, vector<256x4xf32>,
    return
  }
  func.func @transform_0(%arg0: i32, %arg1: memref<512xi32, #tpu.memory_space<smem>>) -> (i32, i32) {
    %c0_i32 = arith.constant 0 : i32
    %c0_i32_0 = arith.constant 0 : i32
    return %arg0, %c0_i32 : i32, i32
  }
  func.func @transform_2(%arg0: i32, %arg1: memref<512xi32, #tpu.memory_space<smem>>) -> (i32, i32) {
    %c0_i32 = arith.constant 0 : i32
    %c0_i32_0 = arith.constant 0 : i32
    return %arg0, %c0_i32 : i32, i32
  }
}

</mosaic_0001>

<bundles_post_ra>
// kernel: tpu_custom_call.1
= control target key start
LH: loop header
LB: loop body
LE: loop exit
PB: predicated region body
PF: predicated region fallthrough
CT: control target
= control target key end

     0   :  { %s1822_s15 = smov [#allocation5]   ;;  %s3181_s0 = inlined_call_operand.vmem [shape: s32[512], index: 0, kind: input, shape index: {}]   ;;  %s3182_s1 = inlined_call_operand.vmem [shape: f32[512,3], index: 1, kind: input, shape index: {}]   ;;  %s3183_s2 = inlined_call_operand.vmem [shape: f32[4096,4], index: 2, kind: input, shape index: {}]   ;;  %s3184_s3 = inlined_call_operand.vmem [shape: f32[512,4], index: 3, kind: output, shape index: {}]  }
   0x1   :  { %s9_s14 = sshll.u32 %s3181_s0, 4  ;;  %s10_s14 = int_to_ptr.vmem [resolvable:$true] %s9_s14 }
   0x2   :  { %12 = dma.vmem_to_smem %s10_s14, 64, %s1822_s15, [#allocation4] }
   0x3   :  { %1806 = dma.done.wait [#allocation4], 64 }
   0x4   :  { %1807 = vsyncadd [#allocation4], 4294967232 }
   0x5   :  { %15 = sfence }
   0x6   :  { %s1849_s16 = smov 0  }
   0x7 LB: > { %s1578_s17 = sadd.s32 4294967295, %s1812_s16   ;;  %p1582_p0 = scmp.ge.s32.totalorder %s1812_s16, 1  ;;  %s1812_s16 = sphi %s1849_s16, %s21_s16  }
   0x8   : > { %p98_p1 = scmp.lt.s32.totalorder %s1812_s16, 3 }
   0xa   : > { %p99_p2 = pnand %p1582_p0, %p98_p1 }
   0xc   : > { %102 = sbr.rel (%p99_p2) target bundleno = 527 (0x20f), region = 24 }
  0x11   : > { %s1583_s0 = sshll.u32 %s1578_s17, 5  ;;  %s1587_s18 = sshll.u32 %s1578_s17, 8 }
  0x12   : > { %p119_p3 = scmp.lt.s32.totalorder %s1583_s0, 63  ;;  %s1814_s26 = smov 0  }
  0x14   : > { %s3349_s0 = smov (!%p119_p3, %s1583_s0), 63 }
  0x15   : > { %s1584_s19 = sshll.u32 %s3349_s0, 3 }
  0x16   : > { %s1860_s22 = scalar_lea.vmem %s3182_s1, %s1584_s19  ;;  %s1865_s25 = scalar_lea.vmem %s3184_s3, %s1584_s19 }
  0x17 LB: >> { %s137_s27 = sadd.s32 %s1816_s26, %s1587_s18  ;;  %s140_s5 = scalar_lea.vmem [#allocation2], %s1816_s26  ;;  %s1816_s26 = sphi %s1814_s26, %s136_s26  }
  0x18   : >> { %s138_s28 = sld [smem:[#allocation5 + %s137_s27]] }
  0x1e   : >> { %s139_s4 = scalar_lea.vmem %s3183_s2, %s138_s28 }
  0x1f   : >> { %v155_v0 = vld [vmem:[%s139_s4] sm:$0x1] }
  0x20   : >> { %156 = vst [vmem:[%s140_s5] sm:$0x1] %v155_v0 }
  0x21   : >> { %174 = vsyncadd [#allocation3], 16  ;;  %s136_s26 = sadd.s32 1, %s1816_s26  }
  0x22   : >> { %p133_p4 = scmp.ge.s32.totalorder %s136_s26, 256  }
  0x23   : > { %s1818_s6 = smov (%p133_p4), 0  }
  0x24   : > { %135 = sbr.rel (!%p133_p4) target bundleno = 23 (0x17), region = 104 }
  0x29 LB: >> { %1808 = dma.done.wait [#allocation3], 16  ;;  %s1820_s6 = sphi %s1818_s6, %s180_s6  }
  0x2a   : >> { %1809 = vsyncadd [#allocation3], 4294967280  ;;  %s180_s6 = sadd.s32 1, %s1820_s6  }
  0x2b   : >> { %p177_p5 = scmp.ge.s32.totalorder %s180_s6, 256  }
  0x2c   : > { %v188_v1 = vld [vmem:[%s1860_s22 + $0x20] sm:$0xff] (%p177_p5)  ;;  %v186_v2 = vld [vmem:[%s1860_s22 + $0x10] sm:$0xff] (%p177_p5)  ;;  %v1823_v7 = vmov (%p177_p5), 0   ;;  %v189_v8 = vld [vmem:[%s1860_s22 + $0x28] sm:$0xff] (%p177_p5)  ;;  %s1824_s7 = smov (%p177_p5), 127   ;;  %v3226_v33 = vmov (%p177_p5), 0 }
  0x2d   : > { %179 = sbr.rel (!%p177_p5) target bundleno = 41 (0x29), region = 115  ;;  %v184_v3 = vld [vmem:[%s1860_s22] sm:$0xff] (%p177_p5)  ;;  %v220_v4 = vand.u32 (%p177_p5), 2147483647, %v188_v1  ;;  %v218_v5 = vand.u32 (%p177_p5), 2147483647, %v186_v2  ;;  %1651 = vset.pattern.permute.xlu1 (%p177_p5), %v1823_v7  ;;  %1653 = vset.pattern.permute.xlu0 (%p177_p5), %v1823_v7 }
  0x2e   : > { %v216_v6 = vand.u32 (%p177_p5), 2147483647, %v184_v3  ;;  %v187_v9 = vld [vmem:[%s1860_s22 + $0x18] sm:$0xff] (%p177_p5)  ;;  %v185_v10 = vld [vmem:[%s1860_s22 + $0x8] sm:$0xff] (%p177_p5)  ;;  %1652 = vset.pattern.permute.xlu2 (%p177_p5), %v1823_v7  ;;  %v221_v14 = vand.u32 (%p177_p5), 2147483647, %v189_v8 }
  0x2f   : > { %vm1879_vm0 = vcmp.lt.f32.partialorder (%p177_p5), %v220_v4, 0.5  ;;  %vm1883_vm1 = vcmp.lt.f32.partialorder (%p177_p5), %v218_v5, 0.5  ;;  %v219_v18 = vand.u32 (%p177_p5), 2147483647, %v187_v9  ;;  %v217_v19 = vand.u32 (%p177_p5), 2147483647, %v185_v10 }
  0x30   : > { %vm1887_vm2 = vcmp.lt.f32.partialorder (%p177_p5), %v216_v6, 0.5  ;;  %v1894_v15 = vsel (%p177_p5), %vm1879_vm0, 1, %v1823_v7  ;;  %v1899_v16 = vsel (%p177_p5), %vm1883_vm1, 1, %v1823_v7  ;;  %vm1912_vm3 = vcmp.lt.f32.partialorder (%p177_p5), %v221_v14, 0.5  ;;  %v192_v23 = vld [vmem:[%s1860_s22 + $0x40] sm:$0xff] (%p177_p5)  ;;  %v191_v24 = vld [vmem:[%s1860_s22 + $0x38] sm:$0xff] (%p177_p5) }
  0x31   : > { %v1904_v17 = vsel (%p177_p5), %vm1887_vm2, 1, %v1823_v7  ;;  %320 = vrot.lane.b32.xlu2 (%p177_p5), %v1894_v15, %s1824_s7  ;;  %316 = vrot.lane.b32.xlu1 (%p177_p5), %v1899_v16, %s1824_s7  ;;  %vm1916_vm4 = vcmp.lt.f32.partialorder (%p177_p5), %v219_v18, 0.5  ;;  %vm1920_vm5 = vcmp.lt.f32.partialorder (%p177_p5), %v217_v19, 0.5  ;;  %v190_v25 = vld [vmem:[%s1860_s22 + $0x30] sm:$0xff] (%p177_p5)  ;;  %v1930_v26 = vsel (%p177_p5), %vm1912_vm3, 1, %v1823_v7  ;;  %v195_v35 = vld [vmem:[%s1860_s22 + $0x58] sm:$0xff] (%p177_p5) }
  0x32   : > { %312 = vrot.lane.b32.xlu0 %v1904_v17, %s1824_s7  ;;  %v1935_v27 = vsel %vm1916_vm4, 1, %v1823_v7  ;;  %v1940_v28 = vsel %vm1920_vm5, 1, %v1823_v7  ;;  %v224_v29 = vand.u32 2147483647, %v192_v23  ;;  %v223_v30 = vand.u32 2147483647, %v191_v24 }
  0x33   : > { %v222_v31 = vand.u32 2147483647, %v190_v25  ;;  %v194_v36 = vld [vmem:[%s1860_s22 + $0x50] sm:$0xff]  ;;  %v193_v37 = vld [vmem:[%s1860_s22 + $0x48] sm:$0xff]  ;;  %v227_v41 = vand.u32 2147483647, %v195_v35 }
  0x34   : > { %vm1948_vm6 = vcmp.lt.f32.partialorder %v224_v29, 0.5  ;;  %vm1952_vm7 = vcmp.lt.f32.partialorder %v223_v30, 0.5  ;;  %v226_v42 = vand.u32 2147483647, %v194_v36  ;;  %v225_v43 = vand.u32 2147483647, %v193_v37 }
  0x35   : > { %v3227_v33 = vsel %vm1952_vm7, 4294967295, %v3226_v33  ;;  %vm1956_vm8 = vcmp.lt.f32.partialorder %v222_v31, 0.5  ;;  %v1966_v38 = vsel %vm1948_vm6, 1, %v1823_v7  ;;  %v1971_v39 = vsel %vm1952_vm7, 1, %v1823_v7  ;;  %v198_v47 = vld [vmem:[%s1860_s22 + $0x70] sm:$0xff]  ;;  %v197_v48 = vld [vmem:[%s1860_s22 + $0x68] sm:$0xff] }
  0x36   : > { %v1976_v40 = vsel %vm1956_vm8, 1, %v1823_v7  ;;  %vm1984_vm9 = vcmp.lt.f32.partialorder %v227_v41, 0.5  ;;  %v3230_v44 = vmov 0  ;;  %vm1988_vm10 = vcmp.lt.f32.partialorder %v226_v42, 0.5  ;;  %v196_v49 = vld [vmem:[%s1860_s22 + $0x60] sm:$0xff]  ;;  %v201_v59 = vld [vmem:[%s1860_s22 + $0x88] sm:$0xff] }
  0x37   : > { %v3231_v44 = vsel %vm1984_vm9, 4294967295, %v3230_v44  ;;  %v3232_v45 = vmov 0  ;;  %vm1992_vm11 = vcmp.lt.f32.partialorder %v225_v43, 0.5  ;;  %v3234_v46 = vmov 0  ;;  %v200_v60 = vld [vmem:[%s1860_s22 + $0x80] sm:$0xff]  ;;  %v199_v61 = vld [vmem:[%s1860_s22 + $0x78] sm:$0xff] }
  0x38   : > { %v3233_v45 = vsel %vm1988_vm10, 4294967295, %v3232_v45  ;;  %v3235_v46 = vsel %vm1992_vm11, 4294967295, %v3234_v46  ;;  %v2002_v50 = vsel %vm1984_vm9, 1, %v1823_v7  ;;  %v2007_v51 = vsel %vm1988_vm10, 1, %v1823_v7  ;;  %v204_v8 = vld [vmem:[%s1860_s22 + $0xa0] sm:$0xff]  ;;  %v203_v9 = vld [vmem:[%s1860_s22 + $0x98] sm:$0xff] }
  0x39   : > { %322 = vrot.lane.b32.xlu2 %v1930_v26, %s1824_s7  ;;  %318 = vrot.lane.b32.xlu1 %v1935_v27, %s1824_s7  ;;  %v2012_v52 = vsel %vm1992_vm11, 1, %v1823_v7  ;;  %v230_v53 = vand.u32 2147483647, %v198_v47  ;;  %v229_v54 = vand.u32 2147483647, %v197_v48  ;;  %v3236_v56 = vmov 0 }
  0x3a   : > { %314 = vrot.lane.b32.xlu0 %v1940_v28, %s1824_s7  ;;  %v228_v55 = vand.u32 2147483647, %v196_v49  ;;  %v3238_v57 = vmov 0  ;;  %v3240_v58 = vmov 0  ;;  %v233_v1 = vand.u32 2147483647, %v201_v59 }
  0x3b   : > { %vm2020_vm12 = vcmp.lt.f32.partialorder %v230_v53, 0.5  ;;  %vm2024_vm13 = vcmp.lt.f32.partialorder %v229_v54, 0.5  ;;  %v232_v2 = vand.u32 2147483647, %v200_v60  ;;  %v231_v3 = vand.u32 2147483647, %v199_v61 }
  0x3c   : > { %v3237_v56 = vsel %vm2020_vm12, 4294967295, %v3236_v56  ;;  %v3239_v57 = vsel %vm2024_vm13, 4294967295, %v3238_v57  ;;  %vm2028_vm14 = vcmp.lt.f32.partialorder %v228_v55, 0.5  ;;  %v2038_v62 = vsel %vm2020_vm12, 1, %v1823_v7  ;;  %v202_v10 = vld [vmem:[%s1860_s22 + $0x90] sm:$0xff]  ;;  %v207_v35 = vld [vmem:[%s1860_s22 + $0xb8] sm:$0xff] }
  0x3d   : > { %v3241_v58 = vsel %vm2028_vm14, 4294967295, %v3240_v58  ;;  %v2043_v63 = vsel %vm2024_vm13, 1, %v1823_v7  ;;  %v2048_v0 = vsel %vm2028_vm14, 1, %v1823_v7  ;;  %vm2056_vm15 = vcmp.lt.f32.partialorder %v233_v1, 0.5  ;;  %v206_v36 = vld [vmem:[%s1860_s22 + $0xb0] sm:$0xff]  ;;  %v205_v37 = vld [vmem:[%s1860_s22 + $0xa8] sm:$0xff] }
  0x3e   : > { %v3242_v4 = vmov 0  ;;  %vm2060_vm13 = vcmp.lt.f32.partialorder %v232_v2, 0.5  ;;  %v3244_v5 = vmov 0  ;;  %vm2064_vm14 = vcmp.lt.f32.partialorder %v231_v3, 0.5  ;;  %v210_v59 = vld [vmem:[%s1860_s22 + $0xd0] sm:$0xff]  ;;  %v209_v60 = vld [vmem:[%s1860_s22 + $0xc8] sm:$0xff] }
  0x3f   : > { %v3243_v4 = vsel %vm2056_vm15, 4294967295, %v3242_v4  ;;  %v3245_v5 = vsel %vm2060_vm13, 4294967295, %v3244_v5  ;;  %v3246_v6 = vmov 0  ;;  %v2074_v14 = vsel %vm2056_vm15, 1, %v1823_v7  ;;  %v208_v61 = vld [vmem:[%s1860_s22 + $0xc0] sm:$0xff]  ;;  %s1825_s8 = smov 126  }
  0x40   : > { %v3247_v6 = vsel %vm2064_vm14, 4294967295, %v3246_v6  ;;  %v2079_v18 = vsel %vm2060_vm13, 1, %v1823_v7  ;;  %v2084_v19 = vsel %vm2064_vm14, 1, %v1823_v7  ;;  %v236_v23 = vand.u32 2147483647, %v204_v8 }
  0x41   : > { %328 = vrot.lane.b32.xlu2 %v1966_v38, %s1824_s7  ;;  %326 = vrot.lane.b32.xlu1 %v1971_v39, %s1824_s7  ;;  %v235_v24 = vand.u32 2147483647, %v203_v9  ;;  %v234_v25 = vand.u32 2147483647, %v202_v10  ;;  %v3248_v29 = vmov 0  ;;  %v3250_v30 = vmov 0 }
  0x42   : > { %324 = vrot.lane.b32.xlu0 %v1976_v40, %s1824_s7  ;;  %vm2092_vm15 = vcmp.lt.f32.partialorder %v236_v23, 0.5  ;;  %v3252_v31 = vmov 0  ;;  %v239_v47 = vand.u32 2147483647, %v207_v35  ;;  %v238_v48 = vand.u32 2147483647, %v206_v36 }
  0x43   : > { %v3249_v29 = vsel %vm2092_vm15, 4294967295, %v3248_v29  ;;  %vm2096_vm13 = vcmp.lt.f32.partialorder %v235_v24, 0.5  ;;  %vm2100_vm14 = vcmp.lt.f32.partialorder %v234_v25, 0.5  ;;  %v2110_v41 = vsel %vm2092_vm15, 1, %v1823_v7  ;;  %v213_v35 = vld [vmem:[%s1860_s22 + $0xe8] sm:$0xff]  ;;  %v212_v36 = vld [vmem:[%s1860_s22 + $0xe0] sm:$0xff] }
  0x44   : > { %v3251_v30 = vsel %vm2096_vm13, 4294967295, %v3250_v30  ;;  %v3253_v31 = vsel %vm2100_vm14, 4294967295, %v3252_v31  ;;  %v2115_v42 = vsel %vm2096_vm13, 1, %v1823_v7  ;;  %v2120_v43 = vsel %vm2100_vm14, 1, %v1823_v7 }
  0x45   : > { %v237_v49 = vand.u32 2147483647, %v205_v37  ;;  %vm2128_vm15 = vcmp.lt.f32.partialorder %v239_v47, 0.5  ;;  %v3254_v53 = vmov 0  ;;  %vm2132_vm13 = vcmp.lt.f32.partialorder %v238_v48, 0.5  ;;  %v211_v37 = vld [vmem:[%s1860_s22 + $0xd8] sm:$0xff] }
  0x46   : > { %v3255_v53 = vsel %vm2128_vm15, 4294967295, %v3254_v53  ;;  %v3256_v54 = vmov 0  ;;  %v3258_v55 = vmov 0  ;;  %v2146_v1 = vsel %vm2128_vm15, 1, %v1823_v7 }
  0x47   : > { %v3257_v54 = vsel %vm2132_vm13, 4294967295, %v3256_v54  ;;  %vm2136_vm14 = vcmp.lt.f32.partialorder %v237_v49, 0.5  ;;  %v2151_v2 = vsel %vm2132_vm13, 1, %v1823_v7  ;;  %v242_v8 = vand.u32 2147483647, %v210_v59 }
  0x48   : > { %v3259_v55 = vsel %vm2136_vm14, 4294967295, %v3258_v55  ;;  %v2156_v3 = vsel %vm2136_vm14, 1, %v1823_v7  ;;  %v241_v9 = vand.u32 2147483647, %v209_v60  ;;  %v240_v10 = vand.u32 2147483647, %v208_v61 }
  0x49   : > { %334 = vrot.lane.b32.xlu2 %v2002_v50, %s1824_s7  ;;  %332 = vrot.lane.b32.xlu1 %v2007_v51, %s1824_s7  ;;  %vm2164_vm15 = vcmp.lt.f32.partialorder %v242_v8, 0.5  ;;  %v3260_v23 = vmov 0  ;;  %v3262_v24 = vmov 0  ;;  %v3264_v25 = vmov 0 }
  0x4a   : > { %330 = vrot.lane.b32.xlu0 %v2012_v52, %s1824_s7  ;;  %v3261_v23 = vsel %vm2164_vm15, 4294967295, %v3260_v23  ;;  %vm2168_vm13 = vcmp.lt.f32.partialorder %v241_v9, 0.5  ;;  %vm2172_vm14 = vcmp.lt.f32.partialorder %v240_v10, 0.5  ;;  %v2182_v47 = vsel %vm2164_vm15, 1, %v1823_v7 }
  0x4b   : > { %v3263_v24 = vsel %vm2168_vm13, 4294967295, %v3262_v24  ;;  %v3265_v25 = vsel %vm2172_vm14, 4294967295, %v3264_v25  ;;  %v2187_v48 = vsel %vm2168_vm13, 1, %v1823_v7  ;;  %v2192_v49 = vsel %vm2172_vm14, 1, %v1823_v7 }
  0x4c   : > { %3266 = vst [vmem:[#allocation9_spill] sm:$0xff] %v3265_v25  ;;  %v245_v59 = vand.u32 2147483647, %v213_v35  ;;  %v244_v60 = vand.u32 2147483647, %v212_v36  ;;  %v3267_v8 = vmov 0 }
  0x4d   : > { %v243_v61 = vand.u32 2147483647, %v211_v37  ;;  %v3270_v9 = vmov 0  ;;  %v3273_v10 = vmov 0  ;;  %v215_v35 = vld [vmem:[%s1860_s22 + $0xf8] sm:$0xff]  ;;  %v214_v36 = vld [vmem:[%s1860_s22 + $0xf0] sm:$0xff] }
  0x4e   : > { %vm2200_vm15 = vcmp.lt.f32.partialorder %v245_v59, 0.5  ;;  %vm2204_vm13 = vcmp.lt.f32.partialorder %v244_v60, 0.5  ;;  %v246_v25 = vand.u32 2147483647, %v214_v36 }
  0x4f   : > { %v3268_v8 = vsel %vm2200_vm15, 4294967295, %v3267_v8  ;;  %v3271_v9 = vsel %vm2204_vm13, 4294967295, %v3270_v9  ;;  %vm2208_vm14 = vcmp.lt.f32.partialorder %v243_v61, 0.5  ;;  %v2217_v37 = vsel %vm2200_vm15, 1, %v1823_v7 }
  0x50   : > { %3269 = vst [vmem:[#allocation10_spill] sm:$0xff] %v3268_v8  ;;  %v3274_v10 = vsel %vm2208_vm14, 4294967295, %v3273_v10  ;;  %v2222_v59 = vsel %vm2204_vm13, 1, %v1823_v7  ;;  %v307_v60 = vsel %vm2208_vm14, 1, %v1823_v7  ;;  %v247_v61 = vand.u32 2147483647, %v215_v35 }
  0x51   : > { %340 = vrot.lane.b32.xlu2 %v2038_v62, %s1824_s7  ;;  %338 = vrot.lane.b32.xlu1 %v2043_v63, %s1824_s7  ;;  %3272 = vst [vmem:[#allocation11_spill] sm:$0xff] %v3271_v9  ;;  %v3275_v8 = vmov 0  ;;  %vm2236_vm13 = vcmp.lt.f32.partialorder %v246_v25, 0.5  ;;  %v3277_v9 = vmov 0 }
  0x52   : > { %336 = vrot.lane.b32.xlu0 %v2048_v0, %s1824_s7  ;;  %vm2232_vm15 = vcmp.lt.f32.partialorder %v247_v61, 0.5  ;;  %v3278_v9 = vsel %vm2236_vm13, 4294967295, %v3277_v9  ;;  %v310_v36 = vsel %vm2236_vm13, 1, %v1823_v7 }
  0x53   : > { %v3276_v8 = vsel %vm2232_vm15, 4294967295, %v3275_v8  ;;  %v311_v35 = vsel %vm2232_vm15, 1, %v1823_v7 }
  0x59   : > { %346 = vrot.lane.b32.xlu2 %v2074_v14, %s1824_s7  ;;  %344 = vrot.lane.b32.xlu1 %v2079_v18, %s1824_s7 }
  0x5a   : > { %342 = vrot.lane.b32.xlu0 %v2084_v19, %s1824_s7 }
  0x61   : > { %352 = vrot.lane.b32.xlu2 %v2110_v41, %s1824_s7  ;;  %350 = vrot.lane.b32.xlu1 %v2115_v42, %s1824_s7 }
  0x62   : > { %348 = vrot.lane.b32.xlu0 %v2120_v43, %s1824_s7 }
  0x69   : > { %358 = vrot.lane.b32.xlu2 %v2146_v1, %s1824_s7  ;;  %356 = vrot.lane.b32.xlu1 %v2151_v2, %s1824_s7 }
  0x6a   : > { %354 = vrot.lane.b32.xlu0 %v2156_v3, %s1824_s7 }
  0x71   : > { %364 = vrot.lane.b32.xlu2 %v2182_v47, %s1824_s7  ;;  %362 = vrot.lane.b32.xlu1 %v2187_v48, %s1824_s7 }
  0x72   : > { %360 = vrot.lane.b32.xlu0 %v2192_v49, %s1824_s7 }
  0x79   : > { %370 = vrot.lane.b32.xlu2 %v2217_v37, %s1824_s7  ;;  %368 = vrot.lane.b32.xlu1 %v2222_v59, %s1824_s7 }
  0x7a   : > { %366 = vrot.lane.b32.xlu0 %v307_v60, %s1824_s7 }
  0x81   : > { %374 = vrot.lane.b32.xlu1 %v311_v35, %s1824_s7  ;;  %440 = vrot.lane.b32.xlu2 %v1904_v17, %s1825_s8 }
  0x82   : > { %372 = vrot.lane.b32.xlu0 %v310_v36, %s1824_s7 }
  0x89   : > { %444 = vrot.lane.b32.xlu1 %v1899_v16, %s1825_s8  ;;  %446 = vrot.lane.b32.xlu2 %v1935_v27, %s1825_s8 }
  0x8a   : > { %442 = vrot.lane.b32.xlu0 %v1940_v28, %s1825_s8 }
  0x8b   : > { %v2256_v25 = vpop.permute.xlu2 %320 }
  0x91   : > { %450 = vrot.lane.b32.xlu1 %v1930_v26, %s1825_s8  ;;  %452 = vrot.lane.b32.xlu2 %v1976_v40, %s1825_s8 }
  0x92   : > { %448 = vrot.lane.b32.xlu0 %v1894_v15, %s1825_s8 }
  0x93   : > { %v2264_v17 = vpop.permute.xlu2 %322 }
  0x99   : > { %456 = vrot.lane.b32.xlu1 %v1966_v38, %s1825_s8  ;;  %458 = vrot.lane.b32.xlu2 %v2012_v52, %s1825_s8 }
  0x9a   : > { %454 = vrot.lane.b32.xlu0 %v1971_v39, %s1825_s8 }
  0x9b   : > { %v2272_v16 = vpop.permute.xlu2 %328 }
  0xa1   : > { %462 = vrot.lane.b32.xlu1 %v2002_v50, %s1825_s8  ;;  %464 = vrot.lane.b32.xlu2 %v2048_v0, %s1825_s8 }
  0xa2   : > { %460 = vrot.lane.b32.xlu0 %v2007_v51, %s1825_s8 }
  0xa3   : > { %v2280_v15 = vpop.permute.xlu2 %334  ;;  %v2282_v26 = vpop.permute.xlu1 %316 }
  0xa4   : > { %v313_v27 = vpop.permute.xlu0 %312 }
  0xa5   : > { %vm376_vm13 = vcmp.ne.s32.totalorder %v313_v27, 0 }
  0xa6   : > { %vm408_vm14 = vmand %vm1887_vm2, %vm376_vm13  ;;  %vm378_vm2 = vcmp.ne.s32.totalorder %v2282_v26, 0 }
  0xa9   : > { %468 = vrot.lane.b32.xlu1 %v2038_v62, %s1825_s8  ;;  %470 = vrot.lane.b32.xlu2 %v2084_v19, %s1825_s8 }
  0xaa   : > { %466 = vrot.lane.b32.xlu0 %v2043_v63, %s1825_s8 }
  0xab   : > { %v2290_v28 = vpop.permute.xlu2 %340  ;;  %v319_v38 = vpop.permute.xlu1 %318 }
  0xac   : > { %v2292_v39 = vpop.permute.xlu0 %314  ;;  %vm379_vm10 = vcmp.ne.s32.totalorder %v319_v38, 0 }
  0xad   : > { %vm411_vm9 = vmand %vm1916_vm4, %vm379_vm10 }
  0xae   : > { %vm410_vm4 = vmand %vm1883_vm1, %vm378_vm2 }
  0xb1   : > { %474 = vrot.lane.b32.xlu1 %v2074_v14, %s1825_s8  ;;  %476 = vrot.lane.b32.xlu2 %v2120_v43, %s1825_s8 }
  0xb2   : > { %472 = vrot.lane.b32.xlu0 %v2079_v18, %s1825_s8 }
  0xb3   : > { %v2300_v40 = vpop.permute.xlu2 %346  ;;  %v2302_v50 = vpop.permute.xlu1 %326 }
  0xb4   : > { %v2304_v51 = vpop.permute.xlu0 %324 }
  0xb9   : > { %480 = vrot.lane.b32.xlu1 %v2110_v41, %s1825_s8  ;;  %482 = vrot.lane.b32.xlu2 %v2156_v3, %s1825_s8 }
  0xba   : > { %478 = vrot.lane.b32.xlu0 %v2115_v42, %s1825_s8 }
  0xbb   : > { %v2312_v52 = vpop.permute.xlu2 %352  ;;  %v2314_v62 = vpop.permute.xlu1 %332 }
  0xbc   : > { %v2316_v63 = vpop.permute.xlu0 %330 }
  0xc1   : > { %486 = vrot.lane.b32.xlu1 %v2146_v1, %s1825_s8  ;;  %488 = vrot.lane.b32.xlu2 %v2192_v49, %s1825_s8 }
  0xc2   : > { %484 = vrot.lane.b32.xlu0 %v2151_v2, %s1825_s8 }
  0xc3   : > { %v2324_v0 = vpop.permute.xlu2 %358  ;;  %v2326_v14 = vpop.permute.xlu1 %338 }
  0xc4   : > { %v2328_v18 = vpop.permute.xlu0 %336 }
  0xc9   : > { %492 = vrot.lane.b32.xlu1 %v2182_v47, %s1825_s8  ;;  %494 = vrot.lane.b32.xlu2 %v307_v60, %s1825_s8 }
  0xca   : > { %490 = vrot.lane.b32.xlu0 %v2187_v48, %s1825_s8 }
  0xcb   : > { %v2335_v19 = vpop.permute.xlu2 %364  ;;  %v2337_v41 = vpop.permute.xlu1 %344 }
  0xcc   : > { %v2339_v42 = vpop.permute.xlu0 %342 }
  0xd1   : > { %498 = vrot.lane.b32.xlu1 %v2217_v37, %s1825_s8  ;;  %500 = vrot.lane.b32.xlu2 %v310_v36, %s1825_s8 }
  0xd2   : > { %496 = vrot.lane.b32.xlu0 %v2222_v59, %s1825_s8 }
  0xd3   : > { %v2346_v43 = vpop.permute.xlu2 %370  ;;  %v2348_v1 = vpop.permute.xlu1 %350 }
  0xd4   : > { %v2350_v2 = vpop.permute.xlu0 %348 }
  0xda   : > { %502 = vrot.lane.b32.xlu0 %v311_v35, %s1825_s8 }
  0xdb   : > { %v2353_v3 = vpop.permute.xlu1 %356  ;;  %v441_v47 = vpop.permute.xlu2 %440 }
  0xdc   : > { %vm504_vm15 = vcmp.ne.s32.totalorder %v441_v47, 0  ;;  %v2355_v48 = vpop.permute.xlu0 %354 }
  0xdd   : > { %vm536_vm12 = vmand %vm408_vm14, %vm504_vm15  ;;  %vm381_vm14 = vcmp.ne.s32.totalorder %v2264_v17, 0  ;;  %vm380_vm15 = vcmp.ne.s32.totalorder %v2256_v25, 0 }
  0xde   : > { %v600_v49 = vsel %vm536_vm12, 1, %v1823_v7  ;;  %vm377_vm12 = vcmp.ne.s32.totalorder %v2292_v39, 0  ;;  %vm413_vm1 = vmand %vm1912_vm3, %vm381_vm14 }
  0xdf   : > { %633 = vperm.xlu1 %1651, %v600_v49  }
  0xe3   : > { %v2360_v37 = vpop.permute.xlu1 %362  ;;  %v447_v59 = vpop.permute.xlu2 %446 }
  0xe4   : > { %vm507_vm11 = vcmp.ne.s32.totalorder %v447_v59, 0  ;;  %v2362_v60 = vpop.permute.xlu0 %360 }
  0xe5   : > { %vm539_vm7 = vmand %vm411_vm9, %vm507_vm11 }
  0xe6   : > { %v603_v61 = vsel %vm539_vm7, 1, %v1823_v7  ;;  %vm409_vm11 = vmand %vm1920_vm5, %vm377_vm12 }
  0xe7   : > { %642 = vperm.xlu1 %1651, %v603_v61   ;;  %vm412_vm12 = vmand %vm1879_vm0, %vm380_vm15 }
  0xeb   : > { %v2367_v13 = vpop.permute.xlu1 %368  ;;  %v453_v38 = vpop.permute.xlu2 %452 }
  0xec   : > { %v2369_v35 = vpop.permute.xlu0 %366 }
  0xf3   : > { %v2371_v36 = vpop.permute.xlu1 %374  ;;  %v459_v26 = vpop.permute.xlu2 %458 }
  0xf4   : > { %v2373_v27 = vpop.permute.xlu0 %372 }
  0xfb   : > { %v445_v47 = vpop.permute.xlu1 %444  ;;  %v465_v11 = vpop.permute.xlu2 %464 }
  0xfc   : > { %vm506_vm9 = vcmp.ne.s32.totalorder %v445_v47, 0  ;;  %v443_v21 = vpop.permute.xlu0 %442 }
  0xfd   : > { %vm538_vm7 = vmand %vm410_vm4, %vm506_vm9  ;;  %vm505_vm10 = vcmp.ne.s32.totalorder %v443_v21, 0  ;;  %vm384_vm9 = vcmp.ne.s32.totalorder %v2272_v16, 0 }
  0xfe   : > { %v602_v49 = vsel %vm538_vm7, 1, %v1823_v7  ;;  %vm537_vm13 = vmand %vm409_vm11, %vm505_vm10  ;;  %vm382_vm10 = vcmp.ne.s32.totalorder %v2304_v51, 0  ;;  %vm510_vm11 = vcmp.ne.s32.totalorder %v453_v38, 0 }
  0xff   : > { %639 = vperm.xlu0 %1653, %v602_v49   ;;  %v601_v59 = vsel %vm537_vm13, 1, %v1823_v7  ;;  %vm416_vm3 = vmand %vm1948_vm6, %vm384_vm9  ;;  %vm383_vm13 = vcmp.ne.s32.totalorder %v2302_v50, 0  ;;  %vm385_vm9 = vcmp.ne.s32.totalorder %v2316_v63, 0 }
 0x100   : > { %636 = vperm.xlu2 %1652, %v601_v59   ;;  %vm414_vm0 = vmand %vm1956_vm8, %vm382_vm10  ;;  %vm513_vm8 = vcmp.ne.s32.totalorder %v459_v26, 0 }
 0x101   : > { %vm542_vm14 = vmand %vm414_vm0, %vm510_vm11  ;;  %vm386_vm11 = vcmp.ne.s32.totalorder %v2314_v62, 0 }
 0x102   : > { %v606_v32 = vsel %vm542_vm14, 1, %v1823_v7 }
 0x103   : > { %v451_v12 = vpop.permute.xlu1 %450  ;;  %v471_v50 = vpop.permute.xlu2 %470 }
 0x104   : > { %vm509_vm2 = vcmp.ne.s32.totalorder %v451_v12, 0  ;;  %v449_v39 = vpop.permute.xlu0 %448 }
 0x105   : > { %vm541_vm4 = vmand %vm413_vm1, %vm509_vm2  ;;  %vm508_vm5 = vcmp.ne.s32.totalorder %v449_v39, 0 }
 0x106   : > { %v605_v22 = vsel %vm541_vm4, 1, %v1823_v7  ;;  %vm540_vm7 = vmand %vm412_vm12, %vm508_vm5  ;;  %vm3279_vm4 = vnez %v3227_v33  ;;  %vm387_vm12 = vcmp.ne.s32.totalorder %v2280_v15, 0 }
 0x107   : > { %648 = vperm.xlu1 %1651, %v605_v22   ;;  %v604_v25 = vsel %vm540_vm7, 1, %v1823_v7  ;;  %vm415_vm5 = vmand %vm3279_vm4, %vm383_vm13  ;;  %vm3280_vm7 = vnez %v3231_v44 }
 0x108   : > { %645 = vperm.xlu2 %1652, %v604_v25   ;;  %vm419_vm10 = vmand %vm3280_vm7, %vm387_vm12 }
 0x10b   : > { %v457_v20 = vpop.permute.xlu1 %456 }
 0x10c   : > { %vm512_vm15 = vcmp.ne.s32.totalorder %v457_v20, 0  ;;  %v455_v17 = vpop.permute.xlu0 %454 }
 0x10d   : > { %vm544_vm1 = vmand %vm416_vm3, %vm512_vm15  ;;  %vm511_vm2 = vcmp.ne.s32.totalorder %v455_v17, 0  ;;  %vm3281_vm3 = vnez %v3235_v46 }
 0x10e   : > { %v608_v16 = vsel %vm544_vm1, 1, %v1823_v7  ;;  %vm543_vm6 = vmand %vm415_vm5, %vm511_vm2  ;;  %vm3282_vm2 = vnez %v3233_v45  ;;  %vm390_vm5 = vcmp.ne.s32.totalorder %v2290_v28, 0 }
 0x10f   : > { %657 = vperm.xlu1 %1651, %v608_v16   ;;  %v607_v34 = vsel %vm543_vm6, 1, %v1823_v7  ;;  %vm417_vm13 = vmand %vm3281_vm3, %vm385_vm9  ;;  %vm388_vm6 = vcmp.ne.s32.totalorder %v2328_v18, 0  ;;  %vm516_vm9 = vcmp.ne.s32.totalorder %v465_v11, 0  ;;  %v572_v16 = vld [vmem:[#allocation2 + $0x20] sm:$0xff] }
 0x110   : > { %651 = vperm.xlu2 %1652, %v606_v32   ;;  %654 = vperm.xlu0 %1653, %v607_v34   ;;  %vm545_vm0 = vmand %vm417_vm13, %vm513_vm8  ;;  %vm3283_vm8 = vnez %v3237_v56  ;;  %v477_v56 = vpop.permute.xlu2 %476 }
 0x111   : > { %vm418_vm4 = vmand %vm3282_vm2, %vm386_vm11  ;;  %v609_v44 = vsel %vm545_vm0, 1, %v1823_v7  ;;  %vm3284_vm11 = vnez %v3241_v58  ;;  %vm3285_vm0 = vnez %v3239_v57 }
 0x112   : > { %vm422_vm7 = vmand %vm3283_vm8, %vm390_vm5 }
 0x113   : > { %v463_v33 = vpop.permute.xlu1 %462  ;;  %vm420_vm3 = vmand %vm3284_vm11, %vm388_vm6  ;;  %vm519_vm6 = vcmp.ne.s32.totalorder %v471_v50, 0  ;;  %v792_v50 = vlaneseq }
 0x114   : > { %vm515_vm15 = vcmp.ne.s32.totalorder %v463_v33, 0  ;;  %v461_v15 = vpop.permute.xlu0 %460  ;;  %vm548_vm13 = vmand %vm420_vm3, %vm516_vm9  ;;  %vm3286_vm9 = vnez %v3243_v4 }
 0x115   : > { %vm547_vm1 = vmand %vm419_vm10, %vm515_vm15  ;;  %vm514_vm14 = vcmp.ne.s32.totalorder %v461_v15, 0  ;;  %vm389_vm10 = vcmp.ne.s32.totalorder %v2326_v14, 0  ;;  %v612_v58 = vsel %vm548_vm13, 1, %v1823_v7  ;;  %vm3288_vm13 = vnez %v3245_v5 }
 0x116   : > { %v611_v51 = vsel %vm547_vm1, 1, %v1823_v7  ;;  %vm546_vm12 = vmand %vm418_vm4, %vm514_vm14  ;;  %vm393_vm4 = vcmp.ne.s32.totalorder %v2300_v40, 0 }
 0x117   : > { %666 = vperm.xlu1 %1651, %v611_v51   ;;  %v610_v46 = vsel %vm546_vm12, 1, %v1823_v7  ;;  %vm421_vm2 = vmand %vm3285_vm0, %vm389_vm10  ;;  %vm391_vm12 = vcmp.ne.s32.totalorder %v2339_v42, 0  ;;  %vm3287_vm10 = vnez %v3247_v6 }
 0x118   : > { %660 = vperm.xlu2 %1652, %v609_v44   ;;  %663 = vperm.xlu0 %1653, %v610_v46   ;;  %vm425_vm8 = vmand %vm3286_vm9, %vm393_vm4  ;;  %vm394_vm4 = vcmp.ne.s32.totalorder %v2350_v2, 0  ;;  %v483_v18 = vpop.permute.xlu2 %482 }
 0x119   : > { %vm423_vm11 = vmand %vm3287_vm10, %vm391_vm12  ;;  %vm522_vm12 = vcmp.ne.s32.totalorder %v477_v56, 0  ;;  %v2509_v56 = vand.u32 127, %v792_v50 }
 0x11a   : > { %vm551_vm3 = vmand %vm423_vm11, %vm519_vm6  ;;  %vm3289_vm6 = vnez %v3249_v29 }
 0x11b   : > { %v469_v45 = vpop.permute.xlu1 %468  ;;  %v615_v4 = vsel %vm551_vm3, 1, %v1823_v7 }
 0x11c   : > { %vm518_vm15 = vcmp.ne.s32.totalorder %v469_v45, 0  ;;  %v467_v28 = vpop.permute.xlu0 %466 }
 0x11d   : > { %vm550_vm1 = vmand %vm422_vm7, %vm518_vm15  ;;  %vm517_vm14 = vcmp.ne.s32.totalorder %v467_v28, 0  ;;  %vm392_vm7 = vcmp.ne.s32.totalorder %v2337_v41, 0 }
 0x11e   : > { %v614_v62 = vsel %vm550_vm1, 1, %v1823_v7  ;;  %vm549_vm5 = vmand %vm421_vm2, %vm517_vm14  ;;  %vm396_vm2 = vcmp.ne.s32.totalorder %v2312_v52, 0 }
 0x11f   : > { %675 = vperm.xlu1 %1651, %v614_v62   ;;  %v613_v63 = vsel %vm549_vm5, 1, %v1823_v7  ;;  %vm424_vm0 = vmand %vm3288_vm13, %vm392_vm7  ;;  %vm3290_vm7 = vnez %v3253_v31  ;;  %vm3291_vm13 = vnez %v3251_v30 }
 0x120   : > { %669 = vperm.xlu2 %1652, %v612_v58   ;;  %672 = vperm.xlu0 %1653, %v613_v63   ;;  %vm428_vm9 = vmand %vm3289_vm6, %vm396_vm2  ;;  %vm398_vm2 = vcmp.ne.s32.totalorder %v2353_v3, 0  ;;  %vm397_vm6 = vcmp.ne.s32.totalorder %v2355_v48, 0  ;;  %v489_v30 = vpop.permute.xlu2 %488  ;;  %v574_v63 = vld [vmem:[#allocation2 + $0x30] sm:$0xff] }
 0x121   : > { %vm426_vm10 = vmand %vm3290_vm7, %vm394_vm4  ;;  %vm3292_vm4 = vnez %v3255_v53 }
 0x122   : > { %vm554_vm11 = vmand %vm426_vm10, %vm522_vm12  ;;  %vm3294_vm10 = vnez %v3259_v55 }
 0x123   : > { %v475_v57 = vpop.permute.xlu1 %474  ;;  %v618_v29 = vsel %vm554_vm11, 1, %v1823_v7 }
 0x124   : > { %vm521_vm15 = vcmp.ne.s32.totalorder %v475_v57, 0  ;;  %v473_v40 = vpop.permute.xlu0 %472 }
 0x125   : > { %vm553_vm1 = vmand %vm425_vm8, %vm521_vm15  ;;  %vm520_vm14 = vcmp.ne.s32.totalorder %v473_v40, 0  ;;  %vm395_vm8 = vcmp.ne.s32.totalorder %v2348_v1, 0 }
 0x126   : > { %v617_v14 = vsel %vm553_vm1, 1, %v1823_v7  ;;  %vm552_vm5 = vmand %vm424_vm0, %vm520_vm14  ;;  %vm399_vm14 = vcmp.ne.s32.totalorder %v2324_v0, 0 }
 0x127   : > { %684 = vperm.xlu1 %1651, %v617_v14   ;;  %v616_v6 = vsel %vm552_vm5, 1, %v1823_v7  ;;  %vm427_vm0 = vmand %vm3291_vm13, %vm395_vm8  ;;  %vm3293_vm8 = vnez %v3257_v54 }
 0x128   : > { %678 = vperm.xlu2 %1652, %v615_v4   ;;  %681 = vperm.xlu0 %1653, %v616_v6   ;;  %vm431_vm12 = vmand %vm3292_vm4, %vm399_vm14  ;;  %vm401_vm14 = vcmp.ne.s32.totalorder %v2360_v37, 0  ;;  %v495_v3 = vpop.permute.xlu2 %494  ;;  %v3299_v37 = vld [vmem:[#allocation10_spill] sm:$0xff] }
 0x129   : > { %vm430_vm7 = vmand %vm3293_vm8, %vm398_vm2  ;;  %vm400_vm2 = vcmp.ne.s32.totalorder %v2362_v60, 0  ;;  %v3301_v60 = vld [vmem:[#allocation11_spill] sm:$0xff] }
 0x12b   : > { %v481_v5 = vpop.permute.xlu1 %480 }
 0x12c   : > { %vm524_vm15 = vcmp.ne.s32.totalorder %v481_v5, 0  ;;  %v479_v52 = vpop.permute.xlu0 %478 }
 0x12d   : > { %vm556_vm1 = vmand %vm428_vm9, %vm524_vm15  ;;  %vm523_vm3 = vcmp.ne.s32.totalorder %v479_v52, 0  ;;  %vm525_vm9 = vcmp.ne.s32.totalorder %v483_v18, 0 }
 0x12e   : > { %v620_v41 = vsel %vm556_vm1, 1, %v1823_v7  ;;  %vm555_vm5 = vmand %vm427_vm0, %vm523_vm3  ;;  %vm402_vm0 = vcmp.ne.s32.totalorder %v2335_v19, 0  ;;  %v3297_v19 = vld [vmem:[#allocation9_spill] sm:$0xff] }
 0x12f   : > { %693 = vperm.xlu1 %1651, %v620_v41   ;;  %v619_v31 = vsel %vm555_vm5, 1, %v1823_v7  ;;  %vm429_vm15 = vmand %vm3294_vm10, %vm397_vm6  ;;  %vm3295_vm6 = vnez %v3261_v23 }
 0x130   : > { %687 = vperm.xlu2 %1652, %v618_v29   ;;  %690 = vperm.xlu0 %1653, %v619_v31   ;;  %vm557_vm1 = vmand %vm429_vm15, %vm525_vm9  ;;  %vm528_vm9 = vcmp.ne.s32.totalorder %v489_v30, 0 }
 0x131   : > { %v621_v55 = vsel %vm557_vm1, 1, %v1823_v7  ;;  %vm434_vm4 = vmand %vm3295_vm6, %vm402_vm0  ;;  %vm405_vm1 = vcmp.ne.s32.totalorder %v2346_v43, 0  ;;  %vm404_vm0 = vcmp.ne.s32.totalorder %v2367_v13, 0 }
 0x133   : > { %v487_v0 = vpop.permute.xlu1 %486 }
 0x134   : > { %vm527_vm3 = vcmp.ne.s32.totalorder %v487_v0, 0  ;;  %v485_v42 = vpop.permute.xlu0 %484 }
 0x135   : > { %vm559_vm11 = vmand %vm431_vm12, %vm527_vm3  ;;  %vm526_vm13 = vcmp.ne.s32.totalorder %v485_v42, 0  ;;  %vm3296_vm12 = vnez %v3263_v24 }
 0x136   : > { %vm558_vm5 = vmand %vm430_vm7, %vm526_vm13  ;;  %v623_v53 = vsel %vm559_vm11, 1, %v1823_v7  ;;  %vm3298_vm7 = vnez %v3297_v19 }
 0x137   : > { %702 = vperm.xlu1 %1651, %v623_v53   ;;  %v622_v54 = vsel %vm558_vm5, 1, %v1823_v7  ;;  %vm433_vm8 = vmand %vm3296_vm12, %vm401_vm14  ;;  %vm403_vm14 = vcmp.ne.s32.totalorder %v2369_v35, 0  ;;  %v501_v35 = vpop.permute.xlu2 %500 }
 0x138   : > { %696 = vperm.xlu2 %1652, %v621_v55   ;;  %699 = vperm.xlu0 %1653, %v622_v54   ;;  %vm432_vm10 = vmand %vm3298_vm7, %vm400_vm2  ;;  %vm3300_vm2 = vnez %v3299_v37 }
 0x139   : > { %vm560_vm15 = vmand %vm432_vm10, %vm528_vm9  ;;  %vm531_vm9 = vcmp.ne.s32.totalorder %v495_v3, 0 }
 0x13a   : > { %v624_v48 = vsel %vm560_vm15, 1, %v1823_v7  ;;  %vm437_vm6 = vmand %vm3300_vm2, %vm405_vm1  ;;  %vm407_vm15 = vcmp.ne.s32.totalorder %v2371_v36, 0  ;;  %vm406_vm1 = vcmp.ne.s32.totalorder %v2373_v27, 0  ;;  %v568_v27 = vld [vmem:[#allocation2] sm:$0xff] }
 0x13b   : > { %v493_v1 = vpop.permute.xlu1 %492 }
 0x13c   : > { %vm530_vm3 = vcmp.ne.s32.totalorder %v493_v1, 0  ;;  %v491_v2 = vpop.permute.xlu0 %490  ;;  %v570_v1 = vld [vmem:[#allocation2 + $0x10] sm:$0xff] }
 0x13d   : > { %vm562_vm11 = vmand %vm434_vm4, %vm530_vm3  ;;  %vm529_vm13 = vcmp.ne.s32.totalorder %v491_v2, 0  ;;  %vm3302_vm4 = vnez %v3301_v60 }
 0x13e   : > { %vm561_vm5 = vmand %vm433_vm8, %vm529_vm13  ;;  %v626_v23 = vsel %vm562_vm11, 1, %v1823_v7  ;;  %vm3303_vm8 = vnez %v3274_v10 }
 0x13f   : > { %711 = vperm.xlu1 %1651, %v626_v23   ;;  %v625_v24 = vsel %vm561_vm5, 1, %v1823_v7  ;;  %vm436_vm12 = vmand %vm3302_vm4, %vm404_vm0  ;;  %vm534_vm0 = vcmp.ne.s32.totalorder %v501_v35, 0 }
 0x140   : > { %705 = vperm.xlu2 %1652, %v624_v48   ;;  %708 = vperm.xlu0 %1653, %v625_v24   ;;  %vm435_vm7 = vmand %vm3303_vm8, %vm403_vm14  ;;  %vm3304_vm14 = vnez %v3276_v8  ;;  %v571_v8 = vld [vmem:[#allocation2 + $0x18] sm:$0xff]  ;;  %v577_v24 = vld [vmem:[#allocation2 + $0x48] sm:$0xff] }
 0x141   : > { %vm563_vm10 = vmand %vm435_vm7, %vm531_vm9 }
 0x142   : > { %v627_v47 = vsel %vm563_vm10, 1, %v1823_v7  ;;  %vm439_vm2 = vmand %vm3304_vm14, %vm407_vm15 }
 0x143   : > { %v499_v43 = vpop.permute.xlu1 %498 }
 0x144   : > { %vm533_vm3 = vcmp.ne.s32.totalorder %v499_v43, 0  ;;  %v497_v61 = vpop.permute.xlu0 %496 }
 0x145   : > { %vm565_vm11 = vmand %vm437_vm6, %vm533_vm3  ;;  %vm532_vm13 = vcmp.ne.s32.totalorder %v497_v61, 0  ;;  %vm3305_vm6 = vnez %v3278_v9  ;;  %v569_v9 = vld [vmem:[#allocation2 + $0x8] sm:$0xff] }
 0x146   : > { %vm564_vm5 = vmand %vm436_vm12, %vm532_vm13  ;;  %v629_v13 = vsel %vm565_vm11, 1, %v1823_v7 }
 0x147   : > { %720 = vperm.xlu1 %1651, %v629_v13   ;;  %v628_v38 = vsel %vm564_vm5, 1, %v1823_v7  ;;  %vm438_vm9 = vmand %vm3305_vm6, %vm406_vm1  ;;  %vm794_vm1 = vcmp.lt.s32.totalorder %v2509_v56, 3 }
 0x148   : > { %714 = vperm.xlu2 %1652, %v627_v47   ;;  %717 = vperm.xlu0 %1653, %v628_v38   ;;  %vm566_vm4 = vmand %vm438_vm9, %vm534_vm0  ;;  %vm1467_vm0 = vcmask 31744  }
 0x149   : > { %v630_v36 = vsel %vm566_vm4, 1, %v1823_v7 }
 0x14c   : > { %v503_v10 = vpop.permute.xlu0 %502 }
 0x14d   : > { %vm535_vm12 = vcmp.ne.s32.totalorder %v503_v10, 0 }
 0x14e   : > { %vm567_vm8 = vmand %vm439_vm2, %vm535_vm12 }
 0x14f   : > { %v631_v21 = vsel %vm567_vm8, 1, %v1823_v7 }
 0x150   : > { %723 = vperm.xlu2 %1652, %v630_v36   ;;  %726 = vperm.xlu0 %1653, %v631_v21  }
 0x151   : > { %v634_v49 = vpop.permute.xlu1 %633 }
 0x152   : > { %vm728_vm7 = vcmp.eq.s32.totalorder %v634_v49, 1 }
 0x153   : > { %v760_v59 = vsel %vm728_vm7, %v568_v27, 0.0 }
 0x154   : > { %v1588_v26 = vmul.f32 -1.442695, %v760_v59  ;;  %v1403_v31 = vmax.f32 %v760_v59, 0.0 }
 0x156   : > { %1654 = vpow2.f32 %v1588_v26 }
 0x159   : > { %v643_v12 = vpop.permute.xlu1 %642 }
 0x15a   : > { %vm731_vm10 = vcmp.eq.s32.totalorder %v643_v12, 1  ;;  %v637_v39 = vpop.permute.xlu2 %636 }
 0x15b   : > { %v2495_v22 = vsel %vm731_vm10, %v571_v8, 0.0  ;;  %vm729_vm3 = vcmp.eq.s32.totalorder %v637_v39, 1 }
 0x15c   : > { %v1655_v25 = vpop.eup %1654  ;;  %v1591_v11 = vmul.f32 -1.442695, %v2495_v22  ;;  %v2498_v7 = vsel %vm729_vm3, %v569_v9, 0.0  ;;  %v1406_v3 = vmax.f32 %v2495_v22, 0.0 }
 0x15d   : > { %v891_v20 = vadd.f32 1.0, %v1655_v25  ;;  %v1589_v17 = vmul.f32 -1.442695, %v2498_v7 }
 0x15e   : > { %1656 = vpow2.f32 %v1591_v11  ;;  %v573_v11 = vld [vmem:[#allocation2 + $0x28] sm:$0xff] }
 0x15f   : > { %1658 = vrcp.f32 %v891_v20  ;;  %v934_v58 = vand.u32 2147483648, %v891_v20  ;;  %v932_v40 = vand.u32 2147483647, %v891_v20  ;;  %vm928_vm15 = vweird.f32 %v891_v20 }
 0x160   : > { %1660 = vpow2.f32 %v1589_v17 }
 0x161   : > { %v935_v5 = vor.u32 1.1754944e-38, %v934_v58  ;;  %vm933_vm2 = vcmp.eq.f32.partialorder %v932_v40, 8.507059e+37 }
 0x162   : > { %v646_v32 = vpop.permute.xlu2 %645 }
 0x163   : > { %vm732_vm11 = vcmp.eq.s32.totalorder %v646_v32, 1 }
 0x164   : > { %v1657_v34 = vpop.eup %1656  ;;  %v2501_v33 = vsel %vm732_vm11, %v572_v16, 0.0  ;;  %v1404_v16 = vmax.f32 %v2498_v7, 0.0 }
 0x165   : > { %v1659_v15 = vpop.eup %1658  ;;  %v2503_v51 = vadd.f32 1.0, %v1657_v34  ;;  %v1592_v44 = vmul.f32 -1.442695, %v2501_v33  ;;  %v1407_v58 = vmax.f32 %v2501_v33, 0.0 }
 0x166   : > { %v1661_v46 = vpop.eup %1660  ;;  %v924_v45 = vmul.f32 %v1659_v15, %v891_v20  ;;  %vm929_vm13 = vweird.f32 %v1659_v15 }
 0x167   : > { %1662 = vrcp.f32 %v2503_v51  ;;  %v2507_v62 = vadd.f32 1.0, %v1661_v46  ;;  %vm930_vm14 = vmor %vm928_vm15, %vm929_vm13  ;;  %v979_v19 = vand.u32 2147483648, %v2503_v51  ;;  %v977_v37 = vand.u32 2147483647, %v2503_v51 }
 0x168   : > { %v925_v28 = vsub.f32 1.0, %v924_v45  ;;  %1664 = vpow2.f32 %v1592_v44  ;;  %vm973_vm4 = vweird.f32 %v2503_v51 }
 0x169   : > { %1666 = vrcp.f32 %v2507_v62  ;;  %v980_v35 = vor.u32 1.1754944e-38, %v979_v19  ;;  %v949_v38 = vand.u32 2147483648, %v2507_v62  ;;  %v947_v36 = vand.u32 2147483647, %v2507_v62 }
 0x16a   : > { %v926_v57 = vmul.f32 %v1659_v15, %v925_v28  ;;  %v652_v14 = vpop.permute.xlu2 %651  ;;  %vm978_vm10 = vcmp.eq.f32.partialorder %v977_v37, 8.507059e+37  ;;  %vm943_vm3 = vweird.f32 %v2507_v62 }
 0x16b   : > { %vm734_vm5 = vcmp.eq.s32.totalorder %v652_v14, 1  ;;  %v950_v22 = vor.u32 1.1754944e-38, %v949_v38  ;;  %vm948_vm13 = vcmp.eq.f32.partialorder %v947_v36, 8.507059e+37 }
 0x16c   : > { %v927_v4 = vadd.f32 %v1659_v15, %v926_v57  ;;  %v2512_v6 = vsel %vm734_vm5, %v574_v63, 0.0 }
 0x16d   : > { %v1663_v18 = vpop.eup %1662  ;;  %v1594_v52 = vmul.f32 -1.442695, %v2512_v6 }
 0x16e   : > { %v1665_v41 = vpop.eup %1664  ;;  %v931_v29 = vsel %vm930_vm14, %v1659_v15, %v927_v4  ;;  %v969_v30 = vmul.f32 %v1663_v18, %v2503_v51  ;;  %vm974_vm6 = vweird.f32 %v1663_v18  ;;  %v580_v15 = vld [vmem:[#allocation2 + $0x60] sm:$0xff] }
 0x16f   : > { %v936_v0 = vsel %vm933_vm2, %v935_v5, %v931_v29  ;;  %v2517_v42 = vadd.f32 1.0, %v1665_v41  ;;  %1668 = vpow2.f32 %v1594_v52  ;;  %v1667_v53 = vpop.eup %1666  ;;  %vm975_vm8 = vmor %vm973_vm4, %vm974_vm6  ;;  %v1409_v52 = vmax.f32 %v2512_v6, 0.0 }
 0x170   : > { %v1435_v54 = vsel %vm794_vm1, %v936_v0, %v1403_v31  ;;  %v970_v55 = vsub.f32 1.0, %v969_v30  ;;  %v939_v23 = vmul.f32 %v1667_v53, %v2507_v62  ;;  %vm944_vm7 = vweird.f32 %v1667_v53 }
 0x171   : > { %v640_v2 = vpop.permute.xlu0 %639  ;;  %1468 = vst.msk [vmem:[%s1865_s25] sm:$0xff] %vm1467_vm0, %v1435_v54  ;;  %1670 = vrcp.f32 %v2517_v42  ;;  %vm945_vm11 = vmor %vm943_vm3, %vm944_vm7  ;;  %v992_v44 = vand.u32 2147483647, %v2517_v42  ;;  %v994_v46 = vand.u32 2147483648, %v2517_v42  ;;  %vm988_vm2 = vweird.f32 %v2517_v42 }
 0x172   : > { %v971_v48 = vmul.f32 %v1663_v18, %v970_v55  ;;  %v661_v60 = vpop.permute.xlu2 %660  ;;  %vm730_vm9 = vcmp.eq.s32.totalorder %v640_v2, 1  ;;  %v940_v43 = vsub.f32 1.0, %v939_v23  ;;  %v576_v55 = vld [vmem:[#allocation2 + $0x40] sm:$0xff] }
 0x173   : > { %vm737_vm12 = vcmp.eq.s32.totalorder %v661_v60, 1  ;;  %v2529_v61 = vsel %vm730_vm9, %v570_v1, 0.0  ;;  %vm993_vm9 = vcmp.eq.f32.partialorder %v992_v44, 8.507059e+37 }
 0x174   : > { %v972_v13 = vadd.f32 %v1663_v18, %v971_v48  ;;  %v2532_v47 = vsel %vm737_vm12, %v577_v24, 0.0  ;;  %v941_v21 = vmul.f32 %v1667_v53, %v940_v43  ;;  %v1590_v26 = vmul.f32 -1.442695, %v2529_v61 }
 0x175   : > { %v1669_v10 = vpop.eup %1668  ;;  %v1597_v27 = vmul.f32 -1.442695, %v2532_v47  ;;  %v1412_v31 = vmax.f32 %v2532_v47, 0.0  ;;  %v1405_v48 = vmax.f32 %v2529_v61, 0.0  ;;  %v586_v47 = vld [vmem:[#allocation2 + $0x90] sm:$0xff] }
 0x176   : > { %v976_v49 = vsel %vm975_vm8, %v1663_v18, %v972_v13  ;;  %v2536_v59 = vadd.f32 1.0, %v1669_v10  ;;  %v942_v9 = vadd.f32 %v1667_v53, %v941_v21  ;;  %v995_v18 = vor.u32 1.1754944e-38, %v994_v46 }
 0x177   : > { %v1671_v8 = vpop.eup %1670  ;;  %v981_v12 = vsel %vm978_vm10, %v980_v35, %v976_v49  ;;  %1672 = vpow2.f32 %v1597_v27  ;;  %v583_v35 = vld [vmem:[#allocation2 + $0x78] sm:$0xff] }
 0x178   : > { %v1438_v39 = vsel %vm794_vm1, %v981_v12, %v1406_v3  ;;  %v984_v25 = vmul.f32 %v1671_v8, %v2517_v42  ;;  %1674 = vrcp.f32 %v2536_v59  ;;  %v946_v17 = vsel %vm945_vm11, %v1667_v53, %v942_v9 }
 0x179   : > { %v649_v20 = vpop.permute.xlu1 %648  ;;  %1471 = vst.msk [vmem:[%s1865_s25 + $0x18] sm:$0xff] %vm1467_vm0, %v1438_v39  ;;  %v951_v32 = vsel %vm948_vm13, %v950_v22, %v946_v17  ;;  %1676 = vpow2.f32 %v1590_v26  ;;  %vm989_vm15 = vweird.f32 %v1671_v8  ;;  %v1022_v33 = vand.u32 2147483647, %v2536_v59 }
 0x17a   : > { %v985_v34 = vsub.f32 1.0, %v984_v25  ;;  %vm733_vm5 = vcmp.eq.s32.totalorder %v649_v20, 1  ;;  %v670_v50 = vpop.permute.xlu2 %669  ;;  %v1436_v51 = vsel %vm794_vm1, %v951_v32, %v1404_v16  ;;  %vm990_vm6 = vmor %vm988_vm2, %vm989_vm15  ;;  %v1024_v53 = vand.u32 2147483648, %v2536_v59 }
 0x17b   : > { %v2551_v45 = vsel %vm733_vm5, %v573_v11, 0.0  ;;  %1469 = vst.msk [vmem:[%s1865_s25 + $0x8] sm:$0xff] %vm1467_vm0, %v1436_v51  ;;  %vm740_vm14 = vcmp.eq.s32.totalorder %v670_v50, 1  ;;  %vm1018_vm8 = vweird.f32 %v2536_v59  ;;  %vm2579_vm7 = vcmp.eq.f32.partialorder %v1022_v33, 8.507059e+37 }
 0x17c   : > { %v986_v28 = vmul.f32 %v1671_v8, %v985_v34  ;;  %v1593_v7 = vmul.f32 -1.442695, %v2551_v45  ;;  %v2558_v63 = vsel %vm740_vm14, %v580_v15, 0.0  ;;  %v1025_v10 = vor.u32 1.1754944e-38, %v1024_v53  ;;  %v575_v15 = vld [vmem:[#allocation2 + $0x38] sm:$0xff] }
 0x17d   : > { %v1673_v62 = vpop.eup %1672  ;;  %v1600_v4 = vmul.f32 -1.442695, %v2558_v63  ;;  %v1408_v21 = vmax.f32 %v2551_v45, 0.0  ;;  %v1415_v36 = vmax.f32 %v2558_v63, 0.0 }
 0x17e   : > { %v1675_v57 = vpop.eup %1674  ;;  %v987_v40 = vadd.f32 %v1671_v8, %v986_v28  ;;  %v2560_v14 = vadd.f32 1.0, %v1673_v62  ;;  %1678 = vpow2.f32 %v1593_v7 }
 0x17f   : > { %v1014_v5 = vmul.f32 %v1675_v57, %v2536_v59  ;;  %v1677_v41 = vpop.eup %1676  ;;  %vm1019_vm4 = vweird.f32 %v1675_v57 }
 0x180   : > { %v991_v29 = vsel %vm990_vm6, %v1671_v8, %v987_v40  ;;  %1680 = vrcp.f32 %v2560_v14  ;;  %v2569_v54 = vadd.f32 1.0, %v1677_v41  ;;  %v1067_v2 = vand.u32 2147483647, %v2560_v14  ;;  %vm1020_vm3 = vmor %vm1018_vm8, %vm1019_vm4 }
 0x181   : > { %v658_v30 = vpop.permute.xlu1 %657  ;;  %v996_v0 = vsel %vm993_vm9, %v995_v18, %v991_v29  ;;  %v1015_v42 = vsub.f32 1.0, %v1014_v5  ;;  %1682 = vpow2.f32 %v1600_v4  ;;  %v1069_v3 = vand.u32 2147483648, %v2560_v14 }
 0x182   : > { %v1439_v6 = vsel %vm794_vm1, %v996_v0, %v1407_v58  ;;  %vm736_vm12 = vcmp.eq.s32.totalorder %v658_v30, 1  ;;  %v679_v19 = vpop.permute.xlu2 %678  ;;  %1684 = vrcp.f32 %v2569_v54  ;;  %vm1063_vm11 = vweird.f32 %v2560_v14  ;;  %v655_v8 = vpop.permute.xlu0 %654 }
 0x183   : > { %1472 = vst.msk [vmem:[%s1865_s25 + $0x20] sm:$0xff] %vm1467_vm0, %v1439_v6  ;;  %v1016_v1 = vmul.f32 %v1675_v57, %v1015_v42  ;;  %v2584_v37 = vsel %vm736_vm12, %v576_v55, 0.0  ;;  %vm743_vm10 = vcmp.eq.s32.totalorder %v679_v19, 1  ;;  %vm2594_vm13 = vcmp.eq.f32.partialorder %v1067_v2, 8.507059e+37 }
 0x184   : > { %v1679_v23 = vpop.eup %1678  ;;  %v1596_v13 = vmul.f32 -1.442695, %v2584_v37  ;;  %v1070_v26 = vor.u32 1.1754944e-38, %v1069_v3  ;;  %v962_v39 = vand.u32 2147483647, %v2569_v54  ;;  %v964_v22 = vand.u32 2147483648, %v2569_v54 }
 0x185   : > { %v1017_v60 = vadd.f32 %v1675_v57, %v1016_v1  ;;  %v2586_v43 = vadd.f32 1.0, %v1679_v23  ;;  %v2604_v25 = vsel %vm743_vm10, %v583_v35, 0.0  ;;  %vm958_vm5 = vweird.f32 %v2569_v54 }
 0x186   : > { %v1681_v38 = vpop.eup %1680  ;;  %v1411_v34 = vmax.f32 %v2584_v37, 0.0  ;;  %vm735_vm15 = vcmp.eq.s32.totalorder %v655_v8, 1  ;;  %vm2617_vm2 = vcmp.eq.f32.partialorder %v962_v39, 8.507059e+37  ;;  %v965_v7 = vor.u32 1.1754944e-38, %v964_v22 }
 0x187   : > { %v1021_v27 = vsel %vm1020_vm3, %v1675_v57, %v1017_v60  ;;  %v1059_v49 = vmul.f32 %v1681_v38, %v2560_v14  ;;  %1686 = vrcp.f32 %v2586_v43  ;;  %v1683_v12 = vpop.eup %1682  ;;  %vm1064_vm14 = vweird.f32 %v1681_v38 }
 0x188   : > { %v1026_v9 = vsel %vm2579_vm7, %v1025_v10, %v1021_v27  ;;  %v1685_v11 = vpop.eup %1684  ;;  %v2608_v16 = vadd.f32 1.0, %v1683_v12  ;;  %1688 = vpow2.f32 %v1596_v13  ;;  %v1007_v51 = vand.u32 2147483647, %v2586_v43  ;;  %vm1065_vm9 = vmor %vm1063_vm11, %vm1064_vm14 }
 0x189   : > { %v1441_v20 = vsel %vm794_vm1, %v1026_v9, %v1409_v52  ;;  %v1060_v17 = vsub.f32 1.0, %v1059_v49  ;;  %v954_v32 = vmul.f32 %v1685_v11, %v2569_v54  ;;  %v667_v44 = vpop.permute.xlu1 %666  ;;  %v1603_v62 = vmul.f32 -1.442695, %v2604_v25  ;;  %v579_v52 = vld [vmem:[#allocation2 + $0x58] sm:$0xff] }
 0x18a   : > { %1474 = vst.msk [vmem:[%s1865_s25 + $0x30] sm:$0xff] %vm1467_vm0, %v1441_v20  ;;  %1690 = vrcp.f32 %v2608_v16  ;;  %vm1003_vm6 = vweird.f32 %v2586_v43  ;;  %v1009_v40 = vand.u32 2147483648, %v2586_v43  ;;  %v2624_v4 = vsel %vm735_vm15, %v575_v15, 0.0  ;;  %v688_v0 = vpop.permute.xlu2 %687  ;;  %v664_v39 = vpop.permute.xlu0 %663 }
 0x18b   : > { %v1061_v50 = vmul.f32 %v1681_v38, %v1060_v17  ;;  %v955_v46 = vsub.f32 1.0, %v954_v32  ;;  %vm959_vm4 = vweird.f32 %v1685_v11  ;;  %vm739_vm12 = vcmp.eq.s32.totalorder %v667_v44, 1  ;;  %v578_v44 = vld [vmem:[#allocation2 + $0x50] sm:$0xff] }
 0x18c   : > { %vm2629_vm8 = vcmp.eq.f32.partialorder %v1007_v51, 8.507059e+37  ;;  %1692 = vpow2.f32 %v1603_v62  ;;  %v1595_v30 = vmul.f32 -1.442695, %v2624_v4  ;;  %vm960_vm7 = vmor %vm958_vm5, %vm959_vm4  ;;  %v2646_v1 = vsel %vm739_vm12, %v579_v52, 0.0 }
 0x18d   : > { %v1687_v58 = vpop.eup %1686  ;;  %v1062_v57 = vadd.f32 %v1681_v38, %v1061_v50  ;;  %v956_v18 = vmul.f32 %v1685_v11, %v955_v46  ;;  %vm746_vm3 = vcmp.eq.s32.totalorder %v688_v0, 1  ;;  %v1010_v24 = vor.u32 1.1754944e-38, %v1009_v40 }
 0x18e   : > { %v999_v5 = vmul.f32 %v1687_v58, %v2586_v43  ;;  %v1689_v41 = vpop.eup %1688  ;;  %vm1004_vm10 = vweird.f32 %v1687_v58  ;;  %1694 = vpow2.f32 %v1595_v30  ;;  %v1112_v54 = vand.u32 2147483647, %v2608_v16 }
 0x18f   : > { %v1066_v29 = vsel %vm1065_vm9, %v1681_v38, %v1062_v57  ;;  %v957_v42 = vadd.f32 %v1685_v11, %v956_v18  ;;  %v2636_v55 = vadd.f32 1.0, %v1689_v41  ;;  %vm1108_vm11 = vweird.f32 %v2608_v16 }
 0x190   : > { %v1071_v14 = vsel %vm2594_vm13, %v1070_v26, %v1066_v29  ;;  %v1000_v53 = vsub.f32 1.0, %v999_v5  ;;  %v1691_v6 = vpop.eup %1690  ;;  %vm1005_vm13 = vmor %vm1003_vm6, %vm1004_vm10  ;;  %v1114_v10 = vand.u32 2147483648, %v2608_v16  ;;  %v1418_v27 = vmax.f32 %v2604_v25, 0.0 }
 0x191   : > { %v1444_v19 = vsel %vm794_vm1, %v1071_v14, %v1412_v31  ;;  %v961_v2 = vsel %vm960_vm7, %v1685_v11, %v957_v42  ;;  %v1104_v23 = vmul.f32 %v1691_v6, %v2608_v16  ;;  %1696 = vrcp.f32 %v2636_v55  ;;  %v676_v42 = vpop.permute.xlu1 %675 }
 0x192   : > { %1477 = vst.msk [vmem:[%s1865_s25 + $0x48] sm:$0xff] %vm1467_vm0, %v1444_v19  ;;  %v1001_v3 = vmul.f32 %v1687_v58, %v1000_v53  ;;  %v966_v31 = vsel %vm2617_vm2, %v965_v7, %v961_v2  ;;  %v1693_v38 = vpop.eup %1692  ;;  %v1599_v61 = vmul.f32 -1.442695, %v2646_v1  ;;  %v2668_v49 = vsel %vm746_vm3, %v586_v47, 0.0  ;;  %v697_v53 = vpop.permute.xlu2 %696 }
 0x193   : > { %v1437_v60 = vsel %vm794_vm1, %v966_v31, %v1405_v48  ;;  %v1105_v35 = vsub.f32 1.0, %v1104_v23  ;;  %vm1109_vm5 = vweird.f32 %v1691_v6  ;;  %v2670_v26 = vadd.f32 1.0, %v1693_v38 }
 0x194   : > { %v1002_v13 = vadd.f32 %v1687_v58, %v1001_v3  ;;  %1470 = vst.msk [vmem:[%s1865_s25 + $0x10] sm:$0xff] %vm1467_vm0, %v1437_v60  ;;  %v1695_v8 = vpop.eup %1694  ;;  %vm2674_vm15 = vcmp.eq.f32.partialorder %v1112_v54, 8.507059e+37  ;;  %1698 = vpow2.f32 %v1599_v61  ;;  %v1606_v9 = vmul.f32 -1.442695, %v2668_v49  ;;  %vm1110_vm14 = vmor %vm1108_vm11, %vm1109_vm5  ;;  %v582_v54 = vld [vmem:[#allocation2 + $0x70] sm:$0xff] }
 0x195   : > { %v1106_v59 = vmul.f32 %v1691_v6, %v1105_v35  ;;  %v1052_v20 = vand.u32 2147483647, %v2636_v55  ;;  %1700 = vrcp.f32 %v2670_v26  ;;  %v1115_v32 = vor.u32 1.1754944e-38, %v1114_v10 }
 0x196   : > { %v1006_v48 = vsel %vm1005_vm13, %v1687_v58, %v1002_v13  ;;  %v1054_v15 = vand.u32 2147483648, %v2636_v55  ;;  %v2690_v50 = vadd.f32 1.0, %v1695_v8  ;;  %1702 = vpow2.f32 %v1606_v9 }
 0x197   : > { %v1011_v12 = vsel %vm2629_vm8, %v1010_v24, %v1006_v48  ;;  %v1107_v11 = vadd.f32 %v1691_v6, %v1106_v59  ;;  %v1697_v17 = vpop.eup %1696  ;;  %v1410_v51 = vmax.f32 %v2624_v4, 0.0  ;;  %vm738_vm2 = vcmp.eq.s32.totalorder %v664_v39, 1 }
 0x198   : > { %v1440_v22 = vsel %vm794_vm1, %v1011_v12, %v1408_v21  ;;  %v1044_v21 = vmul.f32 %v1697_v17, %v2636_v55  ;;  %v1157_v16 = vand.u32 2147483647, %v2670_v26  ;;  %v1159_v28 = vand.u32 2147483648, %v2670_v26 }
 0x199   : > { %1473 = vst.msk [vmem:[%s1865_s25 + $0x28] sm:$0xff] %vm1467_vm0, %v1440_v22  ;;  %v1111_v45 = vsel %vm1110_vm14, %v1691_v6, %v1107_v11  ;;  %1704 = vrcp.f32 %v2690_v50  ;;  %vm1048_vm6 = vweird.f32 %v2636_v55  ;;  %vm2704_vm9 = vcmp.eq.f32.partialorder %v1052_v20, 8.507059e+37  ;;  %v589_v55 = vld [vmem:[#allocation2 + $0xa8] sm:$0xff] }
 0x19a   : > { %v1116_v46 = vsel %vm2674_vm15, %v1115_v32, %v1111_v45  ;;  %v1045_v62 = vsub.f32 1.0, %v1044_v21  ;;  %v1699_v57 = vpop.eup %1698  ;;  %v1055_v40 = vor.u32 1.1754944e-38, %v1054_v15  ;;  %v1414_v18 = vmax.f32 %v2646_v1, 0.0 }
 0x19b   : > { %v1447_v7 = vsel %vm794_vm1, %v1116_v46, %v1415_v36  ;;  %v1421_v5 = vmax.f32 %v2668_v49, 0.0  ;;  %v2712_v52 = vsel %vm738_vm2, %v578_v44, 0.0  ;;  %v1701_v63 = vpop.eup %1700  ;;  %vm1049_vm4 = vweird.f32 %v1697_v17 }
 0x19c   : > { %1480 = vst.msk [vmem:[%s1865_s25 + $0x60] sm:$0xff] %vm1467_vm0, %v1447_v7  ;;  %v1046_v41 = vmul.f32 %v1697_v17, %v1045_v62  ;;  %v2714_v36 = vadd.f32 1.0, %v1699_v57  ;;  %v1598_v29 = vmul.f32 -1.442695, %v2712_v52  ;;  %v1703_v33 = vpop.eup %1702  ;;  %v1149_v30 = vmul.f32 %v1701_v63, %v2670_v26  ;;  %vm1050_vm7 = vmor %vm1048_vm6, %vm1049_vm4  ;;  %v581_v57 = vld [vmem:[#allocation2 + $0x68] sm:$0xff] }
 0x19d   : > { %vm1153_vm12 = vweird.f32 %v2670_v26  ;;  %vm2719_vm8 = vcmp.eq.f32.partialorder %v1157_v16, 8.507059e+37  ;;  %v1160_v14 = vor.u32 1.1754944e-38, %v1159_v28  ;;  %v1037_v19 = vand.u32 2147483647, %v2690_v50  ;;  %v673_v16 = vpop.permute.xlu0 %672 }
 0x19e   : > { %v1047_v6 = vadd.f32 %v1697_v17, %v1046_v41  ;;  %v1039_v2 = vand.u32 2147483648, %v2690_v50  ;;  %1706 = vrcp.f32 %v2714_v36  ;;  %v1150_v23 = vsub.f32 1.0, %v1149_v30 }
 0x19f   : > { %v1705_v3 = vpop.eup %1704  ;;  %vm1033_vm10 = vweird.f32 %v2690_v50  ;;  %v2730_v47 = vadd.f32 1.0, %v1703_v33  ;;  %1708 = vpow2.f32 %v1598_v29  ;;  %vm742_vm3 = vcmp.eq.s32.totalorder %v676_v42, 1 }
 0x1a0   : > { %v1051_v31 = vsel %vm1050_vm7, %v1697_v17, %v1047_v6  ;;  %v1029_v24 = vmul.f32 %v1705_v3, %v2690_v50  ;;  %vm749_vm11 = vcmp.eq.s32.totalorder %v697_v53, 1  ;;  %v1151_v13 = vmul.f32 %v1701_v63, %v1150_v23 }
 0x1a1   : > { %v1056_v60 = vsel %vm2704_vm9, %v1055_v40, %v1051_v31  ;;  %vm1154_vm13 = vweird.f32 %v1701_v63  ;;  %1710 = vrcp.f32 %v2730_v47  ;;  %vm2740_vm5 = vcmp.eq.f32.partialorder %v1037_v19, 8.507059e+37  ;;  %v585_v40 = vld [vmem:[#allocation2 + $0x88] sm:$0xff] }
 0x1a2   : > { %v1443_v35 = vsel %vm794_vm1, %v1056_v60, %v1411_v34  ;;  %v1030_v38 = vsub.f32 1.0, %v1029_v24  ;;  %v1040_v61 = vor.u32 1.1754944e-38, %v1039_v2  ;;  %v1152_v48 = vadd.f32 %v1701_v63, %v1151_v13  ;;  %vm1155_vm15 = vmor %vm1153_vm12, %vm1154_vm13 }
 0x1a3   : > { %1476 = vst.msk [vmem:[%s1865_s25 + $0x40] sm:$0xff] %vm1467_vm0, %v1443_v35  ;;  %v1097_v59 = vand.u32 2147483647, %v2714_v36  ;;  %v1099_v8 = vand.u32 2147483648, %v2714_v36  ;;  %v2748_v12 = vsel %vm742_vm3, %v582_v54, 0.0  ;;  %vm1034_vm14 = vweird.f32 %v1705_v3 }
 0x1a4   : > { %v1707_v43 = vpop.eup %1706  ;;  %v1031_v37 = vmul.f32 %v1705_v3, %v1030_v38  ;;  %v1602_v34 = vmul.f32 -1.442695, %v2748_v12  ;;  %v2754_v9 = vsel %vm749_vm11, %v589_v55, 0.0  ;;  %v1156_v22 = vsel %vm1155_vm15, %v1701_v63, %v1152_v48  ;;  %vm1035_vm6 = vmor %vm1033_vm10, %vm1034_vm14  ;;  %v706_v38 = vpop.permute.xlu2 %705 }
 0x1a5   : > { %v1709_v39 = vpop.eup %1708  ;;  %v1089_v11 = vmul.f32 %v1707_v43, %v2714_v36  ;;  %vm1093_vm2 = vweird.f32 %v2714_v36  ;;  %v1413_v20 = vmax.f32 %v2712_v52, 0.0  ;;  %v1161_v26 = vsel %vm2719_vm8, %v1160_v14, %v1156_v22  ;;  %v682_v10 = vpop.permute.xlu0 %681 }
 0x1a6   : > { %v1032_v17 = vadd.f32 %v1705_v3, %v1031_v37  ;;  %v2761_v32 = vadd.f32 1.0, %v1709_v39  ;;  %1712 = vpow2.f32 %v1602_v34  ;;  %v1450_v45 = vsel %vm794_vm1, %v1161_v26, %v1418_v27  ;;  %v685_v27 = vpop.permute.xlu1 %684 }
 0x1a7   : > { %v1711_v15 = vpop.eup %1710  ;;  %v1090_v21 = vsub.f32 1.0, %v1089_v11  ;;  %vm2769_vm9 = vcmp.eq.f32.partialorder %v1097_v59, 8.507059e+37  ;;  %v1609_v46 = vmul.f32 -1.442695, %v2754_v9  ;;  %1483 = vst.msk [vmem:[%s1865_s25 + $0x78] sm:$0xff] %vm1467_vm0, %v1450_v45  ;;  %v1100_v7 = vor.u32 1.1754944e-38, %v1099_v8 }
 0x1a8   : > { %v1036_v28 = vsel %vm1035_vm6, %v1705_v3, %v1032_v17  ;;  %v1194_v25 = vmul.f32 %v1711_v15, %v2730_v47  ;;  %1714 = vrcp.f32 %v2761_v32  ;;  %vm1094_vm4 = vweird.f32 %v1707_v43  ;;  %v592_v59 = vld [vmem:[#allocation2 + $0xc0] sm:$0xff] }
 0x1a9   : > { %v1041_v50 = vsel %vm2740_vm5, %v1040_v61, %v1036_v28  ;;  %v1091_v62 = vmul.f32 %v1707_v43, %v1090_v21  ;;  %v1204_v58 = vand.u32 2147483648, %v2730_v47  ;;  %vm1198_vm12 = vweird.f32 %v2730_v47  ;;  %vm1095_vm10 = vmor %vm1093_vm2, %vm1094_vm4  ;;  %v584_v8 = vld [vmem:[#allocation2 + $0x80] sm:$0xff] }
 0x1aa   : > { %v1442_v63 = vsel %vm794_vm1, %v1041_v50, %v1410_v51  ;;  %v1195_v41 = vsub.f32 1.0, %v1194_v25  ;;  %1716 = vpow2.f32 %v1609_v46  ;;  %v1202_v33 = vand.u32 2147483647, %v2730_v47  ;;  %v588_v25 = vld [vmem:[#allocation2 + $0xa0] sm:$0xff] }
 0x1ab   : > { %1475 = vst.msk [vmem:[%s1865_s25 + $0x38] sm:$0xff] %vm1467_vm0, %v1442_v63  ;;  %v1092_v29 = vadd.f32 %v1707_v43, %v1091_v62  ;;  %vm741_vm8 = vcmp.eq.s32.totalorder %v673_v16, 1  ;;  %vm745_vm7 = vcmp.eq.s32.totalorder %v685_v27, 1  ;;  %vm1199_vm3 = vweird.f32 %v1711_v15 }
 0x1ac   : > { %v1713_v30 = vpop.eup %1712  ;;  %v1196_v0 = vmul.f32 %v1711_v15, %v1195_v41  ;;  %v2791_v4 = vsel %vm741_vm8, %v581_v57, 0.0  ;;  %v2793_v51 = vsel %vm745_vm7, %v585_v40, 0.0  ;;  %v1205_v42 = vor.u32 1.1754944e-38, %v1204_v58  ;;  %vm1200_vm11 = vmor %vm1198_vm12, %vm1199_vm3 }
 0x1ad   : > { %v1096_v14 = vsel %vm1095_vm10, %v1707_v43, %v1092_v29  ;;  %v2795_v53 = vadd.f32 1.0, %v1713_v30  ;;  %v1601_v6 = vmul.f32 -1.442695, %v2791_v4  ;;  %v1082_v36 = vand.u32 2147483647, %v2761_v32 }
 0x1ae   : > { %v1715_v19 = vpop.eup %1714  ;;  %v1101_v2 = vsel %vm2769_vm9, %v1100_v7, %v1096_v14  ;;  %v1197_v3 = vadd.f32 %v1711_v15, %v1196_v0  ;;  %v1605_v23 = vmul.f32 -1.442695, %v2793_v51  ;;  %v1084_v54 = vand.u32 2147483648, %v2761_v32  ;;  %v694_v34 = vpop.permute.xlu1 %693 }
 0x1af   : > { %v1446_v31 = vsel %vm794_vm1, %v1101_v2, %v1414_v18  ;;  %v1074_v24 = vmul.f32 %v1715_v19, %v2761_v32  ;;  %1718 = vrcp.f32 %v2795_v53  ;;  %vm1203_vm13 = vcmp.eq.f32.partialorder %v1202_v33, 8.507059e+37 }
 0x1b0   : > { %v1717_v60 = vpop.eup %1716  ;;  %1479 = vst.msk [vmem:[%s1865_s25 + $0x58] sm:$0xff] %vm1467_vm0, %v1446_v31  ;;  %v1201_v13 = vsel %vm1200_vm11, %v1711_v15, %v1197_v3  ;;  %v1417_v1 = vmax.f32 %v2748_v12, 0.0  ;;  %v1424_v55 = vmax.f32 %v2754_v9, 0.0  ;;  %1720 = vpow2.f32 %v1601_v6 }
 0x1b1   : > { %v1206_v18 = vsel %vm1203_vm13, %v1205_v42, %v1201_v13  ;;  %v1075_v35 = vsub.f32 1.0, %v1074_v24  ;;  %v2815_v47 = vadd.f32 1.0, %v1717_v60  ;;  %vm1078_vm5 = vweird.f32 %v2761_v32 }
 0x1b2   : > { %v1453_v61 = vsel %vm794_vm1, %v1206_v18, %v1421_v5  ;;  %vm2822_vm15 = vcmp.eq.f32.partialorder %v1082_v36, 8.507059e+37  ;;  %1722 = vpow2.f32 %v1605_v23  ;;  %vm1079_vm14 = vweird.f32 %v1715_v19 }
 0x1b3   : > { %1486 = vst.msk [vmem:[%s1865_s25 + $0x90] sm:$0xff] %vm1467_vm0, %v1453_v61  ;;  %v1076_v43 = vmul.f32 %v1715_v19, %v1075_v35  ;;  %v1085_v37 = vor.u32 1.1754944e-38, %v1084_v54  ;;  %1724 = vrcp.f32 %v2815_v47  ;;  %v1416_v49 = vmax.f32 %v2791_v4, 0.0  ;;  %vm1080_vm9 = vmor %vm1078_vm5, %vm1079_vm14 }
 0x1b4   : > { %v1420_v5 = vmax.f32 %v2793_v51, 0.0  ;;  %vm752_vm2 = vcmp.eq.s32.totalorder %v706_v38, 1  ;;  %vm744_vm6 = vcmp.eq.s32.totalorder %v682_v10, 1  ;;  %v1142_v11 = vand.u32 2147483647, %v2795_v53  ;;  %v715_v38 = vpop.permute.xlu2 %714  ;;  %v2888_v10 = vpop.permute.xlu0 %690 }
 0x1b5   : > { %v1719_v39 = vpop.eup %1718  ;;  %v1077_v22 = vadd.f32 %v1715_v19, %v1076_v43  ;;  %v2832_v26 = vsel %vm752_vm2, %v592_v59, 0.0  ;;  %v2834_v17 = vsel %vm744_vm6, %v584_v8, 0.0  ;;  %v1144_v45 = vand.u32 2147483648, %v2795_v53 }
 0x1b6   : > { %v1134_v15 = vmul.f32 %v1719_v39, %v2795_v53  ;;  %v1247_v21 = vand.u32 2147483647, %v2815_v47  ;;  %v1612_v44 = vmul.f32 -1.442695, %v2832_v26  ;;  %v1721_v46 = vpop.eup %1720  ;;  %v1249_v28 = vand.u32 2147483648, %v2815_v47 }
 0x1b7   : > { %v1081_v16 = vsel %vm1080_vm9, %v1715_v19, %v1077_v22  ;;  %v1604_v7 = vmul.f32 -1.442695, %v2834_v17  ;;  %vm748_vm4 = vcmp.eq.s32.totalorder %v694_v34, 1  ;;  %v2846_v62 = vadd.f32 1.0, %v1721_v46  ;;  %v595_v34 = vld [vmem:[#allocation2 + $0xd8] sm:$0xff] }
 0x1b8   : > { %v1723_v27 = vpop.eup %1722  ;;  %v1086_v32 = vsel %vm2822_vm15, %v1085_v37, %v1081_v16  ;;  %v1135_v50 = vsub.f32 1.0, %v1134_v15  ;;  %1726 = vpow2.f32 %v1612_v44  ;;  %vm1139_vm12 = vweird.f32 %v1719_v39  ;;  %v594_v44 = vld [vmem:[#allocation2 + $0xd0] sm:$0xff] }
 0x1b9   : > { %v1725_v58 = vpop.eup %1724  ;;  %v1445_v57 = vsel %vm794_vm1, %v1086_v32, %v1413_v20  ;;  %v2852_v40 = vadd.f32 1.0, %v1723_v27  ;;  %1728 = vpow2.f32 %v1604_v7  ;;  %v2858_v29 = vsel %vm748_vm4, %v588_v25, 0.0 }
 0x1ba   : > { %1478 = vst.msk [vmem:[%s1865_s25 + $0x50] sm:$0xff] %vm1467_vm0, %v1445_v57  ;;  %v1136_v63 = vmul.f32 %v1719_v39, %v1135_v50  ;;  %v1239_v41 = vmul.f32 %v1725_v58, %v2815_v47  ;;  %1730 = vrcp.f32 %v2846_v62  ;;  %vm1138_vm8 = vweird.f32 %v2795_v53  ;;  %v703_v57 = vpop.permute.xlu1 %702 }
 0x1bb   : > { %vm2861_vm7 = vcmp.eq.f32.partialorder %v1142_v11, 8.507059e+37  ;;  %v1145_v20 = vor.u32 1.1754944e-38, %v1144_v45  ;;  %1732 = vrcp.f32 %v2852_v40  ;;  %vm1243_vm10 = vweird.f32 %v2815_v47  ;;  %vm1140_vm11 = vmor %vm1138_vm8, %vm1139_vm12 }
 0x1bc   : > { %v1137_v33 = vadd.f32 %v1719_v39, %v1136_v63  ;;  %v1240_v30 = vsub.f32 1.0, %v1239_v41  ;;  %vm2867_vm3 = vcmp.eq.f32.partialorder %v1247_v21, 8.507059e+37  ;;  %v1250_v14 = vor.u32 1.1754944e-38, %v1249_v28 }
 0x1bd   : > { %v1427_v42 = vmax.f32 %v2832_v26, 0.0  ;;  %v1419_v53 = vmax.f32 %v2834_v17, 0.0  ;;  %v1608_v6 = vmul.f32 -1.442695, %v2858_v29  ;;  %vm1244_vm13 = vweird.f32 %v1725_v58 }
 0x1be   : > { %v1727_v19 = vpop.eup %1726  ;;  %v1141_v2 = vsel %vm1140_vm11, %v1719_v39, %v1137_v33  ;;  %v1241_v3 = vmul.f32 %v1725_v58, %v1240_v30  ;;  %v1127_v36 = vand.u32 2147483647, %v2846_v62  ;;  %vm1123_vm5 = vweird.f32 %v2846_v62  ;;  %vm1245_vm15 = vmor %vm1243_vm10, %vm1244_vm13 }
 0x1bf   : > { %v1729_v23 = vpop.eup %1728  ;;  %v1146_v31 = vsel %vm2861_vm7, %v1145_v20, %v1141_v2  ;;  %v2879_v24 = vadd.f32 1.0, %v1727_v19  ;;  %1734 = vpow2.f32 %v1608_v6  ;;  %v1129_v18 = vand.u32 2147483648, %v2846_v62  ;;  %v700_v6 = vpop.permute.xlu0 %699 }
 0x1c0   : > { %v1731_v54 = vpop.eup %1730  ;;  %v1449_v60 = vsel %vm794_vm1, %v1146_v31, %v1417_v1  ;;  %v1242_v13 = vadd.f32 %v1725_v58, %v1241_v3  ;;  %v2886_v35 = vadd.f32 1.0, %v1729_v23  ;;  %v1187_v48 = vand.u32 2147483647, %v2852_v40  ;;  %v591_v31 = vld [vmem:[#allocation2 + $0xb8] sm:$0xff] }
 0x1c1   : > { %v1733_v61 = vpop.eup %1732  ;;  %1482 = vst.msk [vmem:[%s1865_s25 + $0x70] sm:$0xff] %vm1467_vm0, %v1449_v60  ;;  %v1119_v12 = vmul.f32 %v1731_v54, %v2846_v62  ;;  %v1189_v1 = vand.u32 2147483648, %v2852_v40  ;;  %1736 = vrcp.f32 %v2879_v24  ;;  %vm2899_vm14 = vcmp.eq.f32.partialorder %v1127_v36, 8.507059e+37 }
 0x1c2   : > { %v1246_v59 = vsel %vm1245_vm15, %v1725_v58, %v1242_v13  ;;  %v1179_v43 = vmul.f32 %v1733_v61, %v2852_v40  ;;  %vm1183_vm2 = vweird.f32 %v2852_v40  ;;  %1738 = vrcp.f32 %v2886_v35 }
 0x1c3   : > { %v1251_v47 = vsel %vm2867_vm3, %v1250_v14, %v1246_v59  ;;  %v1120_v37 = vsub.f32 1.0, %v1119_v12  ;;  %vm755_vm6 = vcmp.eq.s32.totalorder %v715_v38, 1  ;;  %v1130_v22 = vor.u32 1.1754944e-38, %v1129_v18  ;;  %v587_v14 = vld [vmem:[#allocation2 + $0x98] sm:$0xff]  ;;  %v598_v38 = vld [vmem:[#allocation2 + $0xf0] sm:$0xff] }
 0x1c4   : > { %v1456_v39 = vsel %vm794_vm1, %v1251_v47, %v1424_v55  ;;  %v1180_v11 = vsub.f32 1.0, %v1179_v43  ;;  %v1292_v15 = vand.u32 2147483647, %v2879_v24  ;;  %vm1124_vm9 = vweird.f32 %v1731_v54 }
 0x1c5   : > { %v1735_v45 = vpop.eup %1734  ;;  %1489 = vst.msk [vmem:[%s1865_s25 + $0xa8] sm:$0xff] %vm1467_vm0, %v1456_v39  ;;  %v1121_v21 = vmul.f32 %v1731_v54, %v1120_v37  ;;  %vm2915_vm4 = vcmp.eq.f32.partialorder %v1187_v48, 8.507059e+37  ;;  %v1190_v46 = vor.u32 1.1754944e-38, %v1189_v1  ;;  %vm1184_vm12 = vweird.f32 %v1733_v61  ;;  %vm1125_vm7 = vmor %vm1123_vm5, %vm1124_vm9  ;;  %v590_v37 = vld [vmem:[#allocation2 + $0xb0] sm:$0xff] }
 0x1c6   : > { %v1181_v16 = vmul.f32 %v1733_v61, %v1180_v11  ;;  %v2919_v9 = vadd.f32 1.0, %v1735_v45  ;;  %v2921_v28 = vsel %vm755_vm6, %v595_v34, 0.0  ;;  %vm1288_vm8 = vweird.f32 %v2879_v24  ;;  %vm1185_vm11 = vmor %vm1183_vm2, %vm1184_vm12  ;;  %v712_v11 = vpop.permute.xlu1 %711 }
 0x1c7   : > { %v1737_v55 = vpop.eup %1736  ;;  %v1122_v7 = vadd.f32 %v1731_v54, %v1121_v21  ;;  %v1294_v25 = vand.u32 2147483648, %v2879_v24  ;;  %v1172_v27 = vand.u32 2147483647, %v2886_v35  ;;  %vm2929_vm10 = vcmp.eq.f32.partialorder %v1292_v15, 8.507059e+37 }
 0x1c8   : > { %v1182_v32 = vadd.f32 %v1733_v61, %v1181_v16  ;;  %v1284_v50 = vmul.f32 %v1737_v55, %v2879_v24  ;;  %vm1168_vm3 = vweird.f32 %v2886_v35  ;;  %1740 = vrcp.f32 %v2919_v9  ;;  %v1739_v63 = vpop.eup %1738 }
 0x1c9   : > { %v1126_v41 = vsel %vm1125_vm7, %v1731_v54, %v1122_v7  ;;  %v1174_v62 = vand.u32 2147483648, %v2886_v35  ;;  %v1615_v52 = vmul.f32 -1.442695, %v2921_v28  ;;  %vm747_vm13 = vcmp.eq.s32.totalorder %v2888_v10, 1 }
 0x1ca   : > { %v1131_v20 = vsel %vm2899_vm14, %v1130_v22, %v1126_v41  ;;  %v1186_v33 = vsel %vm1185_vm11, %v1733_v61, %v1182_v32  ;;  %v1285_v30 = vsub.f32 1.0, %v1284_v50  ;;  %v1164_v0 = vmul.f32 %v1739_v63, %v2886_v35 }
 0x1cb   : > { %v1448_v40 = vsel %vm794_vm1, %v1131_v20, %v1416_v49  ;;  %v1191_v19 = vsel %vm2915_vm4, %v1190_v46, %v1186_v33  ;;  %v1295_v2 = vor.u32 1.1754944e-38, %v1294_v25  ;;  %vm2950_vm5 = vcmp.eq.f32.partialorder %v1172_v27, 8.507059e+37  ;;  %v724_v49 = vpop.permute.xlu2 %723  ;;  %v709_v46 = vpop.permute.xlu0 %708 }
 0x1cc   : > { %1481 = vst.msk [vmem:[%s1865_s25 + $0x68] sm:$0xff] %vm1467_vm0, %v1448_v40  ;;  %v1452_v36 = vsel %vm794_vm1, %v1191_v19, %v1420_v5  ;;  %v1286_v23 = vmul.f32 %v1737_v55, %v1285_v30  ;;  %vm1289_vm15 = vweird.f32 %v1737_v55  ;;  %v1165_v4 = vsub.f32 1.0, %v1164_v0 }
 0x1cd   : > { %1485 = vst.msk [vmem:[%s1865_s25 + $0x88] sm:$0xff] %vm1467_vm0, %v1452_v36  ;;  %v1175_v54 = vor.u32 1.1754944e-38, %v1174_v62  ;;  %1742 = vpow2.f32 %v1615_v52  ;;  %v2964_v60 = vsel %vm747_vm13, %v587_v14, 0.0  ;;  %vm751_vm14 = vcmp.eq.s32.totalorder %v703_v57, 1  ;;  %vm1290_vm6 = vmor %vm1288_vm8, %vm1289_vm15  ;;  %v593_v36 = vld [vmem:[#allocation2 + $0xc8] sm:$0xff] }
 0x1ce   : > { %v1741_v13 = vpop.eup %1740  ;;  %v1287_v18 = vadd.f32 %v1737_v55, %v1286_v23  ;;  %v1166_v51 = vmul.f32 %v1739_v63, %v1165_v4  ;;  %vm1169_vm2 = vweird.f32 %v1739_v63  ;;  %v1607_v5 = vmul.f32 -1.442695, %v2964_v60  ;;  %v3032_v23 = vpop.permute.xlu1 %720 }
 0x1cf   : > { %v1224_v61 = vmul.f32 %v1741_v13, %v2919_v9  ;;  %v1232_v12 = vand.u32 2147483647, %v2919_v9  ;;  %v2972_v48 = vsel %vm751_vm14, %v591_v31, 0.0  ;;  %vm758_vm9 = vcmp.eq.s32.totalorder %v724_v49, 1  ;;  %vm1170_vm4 = vmor %vm1168_vm3, %vm1169_vm2 }
 0x1d0   : > { %v1291_v10 = vsel %vm1290_vm6, %v1737_v55, %v1287_v18  ;;  %v1167_v1 = vadd.f32 %v1739_v63, %v1166_v51  ;;  %1744 = vpow2.f32 %v1607_v5  ;;  %v1611_v59 = vmul.f32 -1.442695, %v2972_v48 }
 0x1d1   : > { %v1296_v8 = vsel %vm2929_vm10, %v1295_v2, %v1291_v10  ;;  %v1225_v24 = vsub.f32 1.0, %v1224_v61  ;;  %v1234_v43 = vand.u32 2147483648, %v2919_v9  ;;  %v2980_v47 = vsel %vm758_vm9, %v598_v38, 0.0 }
 0x1d2   : > { %v1459_v34 = vsel %vm794_vm1, %v1296_v8, %v1427_v42  ;;  %v1171_v39 = vsel %vm1170_vm4, %v1739_v63, %v1167_v1  ;;  %1746 = vpow2.f32 %v1611_v59  ;;  %v1618_v22 = vmul.f32 -1.442695, %v2980_v47 }
 0x1d3   : > { %v1743_v15 = vpop.eup %1742  ;;  %1492 = vst.msk [vmem:[%s1865_s25 + $0xc0] sm:$0xff] %vm1467_vm0, %v1459_v34  ;;  %v1176_v35 = vsel %vm2950_vm5, %v1175_v54, %v1171_v39  ;;  %v1226_v45 = vmul.f32 %v1741_v13, %v1225_v24  ;;  %vm1229_vm12 = vweird.f32 %v1741_v13  ;;  %vm750_vm8 = vcmp.eq.s32.totalorder %v700_v6, 1  ;;  %v3040_v54 = vpop.permute.xlu0 %717 }
 0x1d4   : > { %v1451_v26 = vsel %vm794_vm1, %v1176_v35, %v1419_v53  ;;  %v2995_v42 = vadd.f32 1.0, %v1743_v15  ;;  %1748 = vpow2.f32 %v1618_v22  ;;  %v2997_v21 = vsel %vm750_vm8, %v590_v37, 0.0 }
 0x1d5   : > { %1484 = vst.msk [vmem:[%s1865_s25 + $0x80] sm:$0xff] %vm1467_vm0, %v1451_v26  ;;  %v1227_v16 = vadd.f32 %v1741_v13, %v1226_v45  ;;  %vm1228_vm7 = vweird.f32 %v2919_v9  ;;  %v1610_v55 = vmul.f32 -1.442695, %v2997_v21  ;;  %vm754_vm10 = vcmp.eq.s32.totalorder %v712_v11, 1 }
 0x1d6   : > { %v1745_v7 = vpop.eup %1744  ;;  %vm1230_vm3 = vmor %vm1228_vm7, %vm1229_vm12  ;;  %vm1233_vm11 = vcmp.eq.f32.partialorder %v1232_v12, 8.507059e+37  ;;  %v1235_v17 = vor.u32 1.1754944e-38, %v1234_v43  ;;  %v1423_v53 = vmax.f32 %v2858_v29, 0.0  ;;  %1750 = vrcp.f32 %v2995_v42 }
 0x1d7   : > { %v1231_v25 = vsel %vm1230_vm3, %v1741_v13, %v1227_v16  ;;  %v3005_v27 = vadd.f32 1.0, %v1745_v7  ;;  %1752 = vpow2.f32 %v1610_v55  ;;  %v3007_v32 = vsel %vm754_vm10, %v594_v44, 0.0 }
 0x1d8   : > { %v1747_v50 = vpop.eup %1746  ;;  %v1236_v9 = vsel %vm1233_vm11, %v1235_v17, %v1231_v25  ;;  %v1614_v58 = vmul.f32 -1.442695, %v3007_v32  ;;  %v1430_v63 = vmax.f32 %v2921_v28, 0.0  ;;  %v1337_v41 = vand.u32 2147483647, %v2995_v42 }
 0x1d9   : > { %v1455_v57 = vsel %vm794_vm1, %v1236_v9, %v1423_v53  ;;  %1754 = vrcp.f32 %v3005_v27  ;;  %v1339_v62 = vand.u32 2147483648, %v2995_v42  ;;  %v3018_v52 = vadd.f32 1.0, %v1747_v50 }
 0x1da   : > { %v1749_v29 = vpop.eup %1748  ;;  %1488 = vst.msk [vmem:[%s1865_s25 + $0xa0] sm:$0xff] %vm1467_vm0, %v1455_v57  ;;  %1756 = vpow2.f32 %v1614_v58  ;;  %v1219_v20 = vand.u32 2147483648, %v3005_v27  ;;  %v1422_v33 = vmax.f32 %v2964_v60, 0.0  ;;  %v1426_v30 = vmax.f32 %v2972_v48, 0.0 }
 0x1db   : > { %v3023_v0 = vadd.f32 1.0, %v1749_v29  ;;  %v1217_v6 = vand.u32 2147483647, %v3005_v27  ;;  %1758 = vrcp.f32 %v3018_v52  ;;  %v1433_v40 = vmax.f32 %v2980_v47, 0.0  ;;  %v727_v28 = vpop.permute.xlu0 %726 }
 0x1dc   : > { %v1751_v14 = vpop.eup %1750  ;;  %v1425_v19 = vmax.f32 %v2997_v21, 0.0  ;;  %vm1333_vm13 = vweird.f32 %v2995_v42  ;;  %vm753_vm5 = vcmp.eq.s32.totalorder %v709_v46, 1  ;;  %vm3034_vm15 = vcmp.eq.f32.partialorder %v1337_v41, 8.507059e+37 }
 0x1dd   : > { %v1753_v2 = vpop.eup %1752  ;;  %v1329_v3 = vmul.f32 %v1751_v14, %v2995_v42  ;;  %1760 = vrcp.f32 %v3023_v0  ;;  %v1340_v31 = vor.u32 1.1754944e-38, %v1339_v62  ;;  %vm1213_vm14 = vweird.f32 %v3005_v27 }
 0x1de   : > { %v1279_v49 = vand.u32 2147483648, %v3018_v52  ;;  %v1220_v51 = vor.u32 1.1754944e-38, %v1219_v20  ;;  %v1277_v5 = vand.u32 2147483647, %v3018_v52  ;;  %v3043_v38 = vadd.f32 1.0, %v1753_v2  ;;  %v597_v20 = vld [vmem:[#allocation2 + $0xe8] sm:$0xff] }
 0x1df   : > { %v1755_v13 = vpop.eup %1754  ;;  %v1330_v18 = vsub.f32 1.0, %v1329_v3  ;;  %vm3046_vm2 = vcmp.eq.f32.partialorder %v1217_v6, 8.507059e+37  ;;  %v1382_v1 = vand.u32 2147483647, %v3023_v0  ;;  %v1384_v59 = vand.u32 2147483648, %v3023_v0 }
 0x1e0   : > { %v1757_v61 = vpop.eup %1756  ;;  %v1209_v12 = vmul.f32 %v1755_v13, %v3005_v27  ;;  %v3053_v8 = vsel %vm753_vm5, %v593_v36, 0.0  ;;  %vm757_vm6 = vcmp.eq.s32.totalorder %v3032_v23, 1  ;;  %vm1334_vm9 = vweird.f32 %v1751_v14 }
 0x1e1   : > { %v1331_v24 = vmul.f32 %v1751_v14, %v1330_v18  ;;  %vm1273_vm4 = vweird.f32 %v3018_v52  ;;  %1762 = vrcp.f32 %v3043_v38  ;;  %v1759_v43 = vpop.eup %1758  ;;  %v1280_v34 = vor.u32 1.1754944e-38, %v1279_v49  ;;  %vm1335_vm10 = vmor %vm1333_vm13, %vm1334_vm9  ;;  %v596_v18 = vld [vmem:[#allocation2 + $0xe0] sm:$0xff] }
 0x1e2   : > { %v1210_v37 = vsub.f32 1.0, %v1209_v12  ;;  %vm1378_vm12 = vweird.f32 %v3023_v0  ;;  %v3059_v39 = vadd.f32 1.0, %v1757_v61  ;;  %vm1214_vm8 = vweird.f32 %v1755_v13 }
 0x1e3   : > { %v1761_v22 = vpop.eup %1760  ;;  %v1332_v11 = vadd.f32 %v1751_v14, %v1331_v24  ;;  %v1269_v15 = vmul.f32 %v1759_v43, %v3018_v52  ;;  %vm3062_vm7 = vcmp.eq.f32.partialorder %v1277_v5, 8.507059e+37  ;;  %v1613_v45 = vmul.f32 -1.442695, %v3053_v8  ;;  %vm1215_vm13 = vmor %vm1213_vm14, %vm1214_vm8 }
 0x1e4   : > { %v1211_v26 = vmul.f32 %v1755_v13, %v1210_v37  ;;  %v1374_v44 = vmul.f32 %v1761_v22, %v3023_v0  ;;  %vm3070_vm3 = vcmp.eq.f32.partialorder %v1382_v1, 8.507059e+37  ;;  %v1385_v16 = vor.u32 1.1754944e-38, %v1384_v59 }
 0x1e5   : > { %v1262_v55 = vand.u32 2147483647, %v3043_v38  ;;  %v1336_v7 = vsel %vm1335_vm10, %v1751_v14, %v1332_v11  ;;  %v1270_v17 = vsub.f32 1.0, %v1269_v15  ;;  %v1264_v53 = vand.u32 2147483648, %v3043_v38 }
 0x1e6   : > { %1764 = vrcp.f32 %v3059_v39  ;;  %v1341_v42 = vsel %vm3034_vm15, %v1340_v31, %v1336_v7  ;;  %v1212_v25 = vadd.f32 %v1755_v13, %v1211_v26  ;;  %v1375_v50 = vsub.f32 1.0, %v1374_v44 }
 0x1e7   : > { %vm1258_vm11 = vweird.f32 %v3043_v38  ;;  %v1763_v9 = vpop.eup %1762  ;;  %v1462_v58 = vsel %vm794_vm1, %v1341_v42, %v1430_v63  ;;  %v1271_v57 = vmul.f32 %v1759_v43, %v1270_v17  ;;  %vm1274_vm5 = vweird.f32 %v1759_v43 }
 0x1e8   : > { %1766 = vpow2.f32 %v1613_v45  ;;  %1495 = vst.msk [vmem:[%s1865_s25 + $0xd8] sm:$0xff] %vm1467_vm0, %v1462_v58  ;;  %v1216_v29 = vsel %vm1215_vm13, %v1755_v13, %v1212_v25  ;;  %v1376_v41 = vmul.f32 %v1761_v22, %v1375_v50  ;;  %vm1379_vm15 = vweird.f32 %v1761_v22  ;;  %vm1275_vm14 = vmor %vm1273_vm4, %vm1274_vm5 }
 0x1e9   : > { %v1254_v62 = vmul.f32 %v1763_v9, %v3043_v38  ;;  %v1221_v63 = vsel %vm3046_vm2, %v1220_v51, %v1216_v29  ;;  %v1272_v14 = vadd.f32 %v1759_v43, %v1271_v57  ;;  %vm3092_vm9 = vcmp.eq.f32.partialorder %v1262_v55, 8.507059e+37  ;;  %vm1380_vm2 = vmor %vm1378_vm12, %vm1379_vm15  ;;  %v599_v51 = vld [vmem:[#allocation2 + $0xf8] sm:$0xff] }
 0x1ea   : > { %v1265_v6 = vor.u32 1.1754944e-38, %v1264_v53  ;;  %v1454_v2 = vsel %vm794_vm1, %v1221_v63, %v1422_v33  ;;  %v1377_v3 = vadd.f32 %v1761_v22, %v1376_v41  ;;  %vm1259_vm8 = vweird.f32 %v1763_v9 }
 0x1eb   : > { %v1255_v36 = vsub.f32 1.0, %v1254_v62  ;;  %1487 = vst.msk [vmem:[%s1865_s25 + $0x98] sm:$0xff] %vm1467_vm0, %v1454_v2  ;;  %v1276_v31 = vsel %vm1275_vm14, %v1759_v43, %v1272_v14  ;;  %v3109_v60 = vsel %vm757_vm6, %v597_v20, 0.0  ;;  %vm756_vm10 = vcmp.eq.s32.totalorder %v3040_v54, 1  ;;  %vm1260_vm6 = vmor %vm1258_vm11, %vm1259_vm8 }
 0x1ec   : > { %v1765_v4 = vpop.eup %1764  ;;  %vm759_vm13 = vcmp.eq.s32.totalorder %v727_v28, 1  ;;  %v1281_v52 = vsel %vm3062_vm7, %v1280_v34, %v1276_v31  ;;  %v1381_v33 = vsel %vm1380_vm2, %v1761_v22, %v1377_v3  ;;  %v1322_v61 = vand.u32 2147483647, %v3059_v39 }
 0x1ed   : > { %v1256_v49 = vmul.f32 %v1763_v9, %v1255_v36  ;;  %v1314_v13 = vmul.f32 %v1765_v4, %v3059_v39  ;;  %v1458_v23 = vsel %vm794_vm1, %v1281_v52, %v1426_v30  ;;  %v1386_v5 = vsel %vm3070_vm3, %v1385_v16, %v1381_v33 }
 0x1ee   : > { %v1767_v0 = vpop.eup %1766  ;;  %v1617_v12 = vmul.f32 -1.442695, %v3109_v60  ;;  %1491 = vst.msk [vmem:[%s1865_s25 + $0xb8] sm:$0xff] %vm1467_vm0, %v1458_v23  ;;  %v1465_v10 = vsel %vm794_vm1, %v1386_v5, %v1433_v40  ;;  %v1324_v30 = vand.u32 2147483648, %v3059_v39  ;;  %v3137_v24 = vsel %vm756_vm10, %v596_v18, 0.0 }
 0x1ef   : > { %v1257_v1 = vadd.f32 %v1763_v9, %v1256_v49  ;;  %v1315_v59 = vsub.f32 1.0, %v1314_v13  ;;  %v916_v48 = vadd.f32 1.0, %v1767_v0  ;;  %1498 = vst.msk [vmem:[%s1865_s25 + $0xf0] sm:$0xff] %vm1467_vm0, %v1465_v10  ;;  %v3140_v47 = vsel %vm759_vm13, %v599_v51, 0.0 }
 0x1f0   : > { %1768 = vpow2.f32 %v1617_v12  ;;  %vm1319_vm4 = vweird.f32 %v1765_v4  ;;  %v1616_v38 = vmul.f32 -1.442695, %v3137_v24  ;;  %vm1318_vm12 = vweird.f32 %v3059_v39 }
 0x1f1   : > { %v1261_v40 = vsel %vm1260_vm6, %v1763_v9, %v1257_v1  ;;  %v1316_v43 = vmul.f32 %v1765_v4, %v1315_v59  ;;  %1770 = vrcp.f32 %v916_v48  ;;  %v1619_v22 = vmul.f32 -1.442695, %v3140_v47  ;;  %vm1320_vm7 = vmor %vm1318_vm12, %vm1319_vm4 }
 0x1f2   : > { %v1266_v37 = vsel %vm3092_vm9, %v1265_v6, %v1261_v40  ;;  %v1325_v11 = vor.u32 1.1754944e-38, %v1324_v30  ;;  %1772 = vpow2.f32 %v1616_v38  ;;  %vm1323_vm3 = vcmp.eq.f32.partialorder %v1322_v61, 8.507059e+37 }
 0x1f3   : > { %v1457_v34 = vsel %vm794_vm1, %v1266_v37, %v1425_v19  ;;  %v1317_v54 = vadd.f32 %v1765_v4, %v1316_v43  ;;  %v1429_v35 = vmax.f32 %v3007_v32, 0.0  ;;  %1774 = vpow2.f32 %v1619_v22 }
 0x1f4   : > { %1490 = vst.msk [vmem:[%s1865_s25 + $0xb0] sm:$0xff] %vm1467_vm0, %v1457_v34  ;;  %v1309_v7 = vand.u32 2147483648, %v916_v48  ;;  %v1307_v32 = vand.u32 2147483647, %v916_v48  ;;  %vm1303_vm5 = vweird.f32 %v916_v48  ;;  %v1428_v57 = vmax.f32 %v3053_v8, 0.0 }
 0x1f5   : > { %v1321_v15 = vsel %vm1320_vm7, %v1765_v4, %v1317_v54  ;;  %v1432_v3 = vmax.f32 %v3109_v60, 0.0  ;;  %v1431_v59 = vmax.f32 %v3137_v24, 0.0  ;;  %v1434_v43 = vmax.f32 %v3140_v47, 0.0 }
 0x1f6   : > { %v1769_v21 = vpop.eup %1768  ;;  %v1326_v45 = vsel %vm1323_vm3, %v1325_v11, %v1321_v15  ;;  %v1310_v9 = vor.u32 1.1754944e-38, %v1309_v7  ;;  %vm1308_vm9 = vcmp.eq.f32.partialorder %v1307_v32, 8.507059e+37 }
 0x1f7   : > { %v1771_v26 = vpop.eup %1770  ;;  %v1461_v19 = vsel %vm794_vm1, %v1326_v45, %v1429_v35  ;;  %v920_v44 = vadd.f32 1.0, %v1769_v21 }
 0x1f8   : > { %1494 = vst.msk [vmem:[%s1865_s25 + $0xd0] sm:$0xff] %vm1467_vm0, %v1461_v19  ;;  %v1299_v39 = vmul.f32 %v1771_v26, %v916_v48  ;;  %v1773_v46 = vpop.eup %1772  ;;  %vm1304_vm11 = vweird.f32 %v1771_v26 }
 0x1f9   : > { %1776 = vrcp.f32 %v920_v44  ;;  %v1775_v55 = vpop.eup %1774  ;;  %v919_v17 = vadd.f32 1.0, %v1773_v46  ;;  %vm1305_vm15 = vmor %vm1303_vm5, %vm1304_vm11  ;;  %v1367_v28 = vand.u32 2147483647, %v920_v44  ;;  %v1369_v14 = vand.u32 2147483648, %v920_v44 }
 0x1fa   : > { %v1300_v16 = vsub.f32 1.0, %v1299_v39  ;;  %v922_v42 = vadd.f32 1.0, %v1775_v55  ;;  %vm1363_vm8 = vweird.f32 %v920_v44 }
 0x1fb   : > { %1778 = vrcp.f32 %v919_v17  ;;  %vm1368_vm2 = vcmp.eq.f32.partialorder %v1367_v28, 8.507059e+37  ;;  %v1370_v31 = vor.u32 1.1754944e-38, %v1369_v14  ;;  %v1352_v52 = vand.u32 2147483647, %v919_v17 }
 0x1fc   : > { %v1301_v53 = vmul.f32 %v1771_v26, %v1300_v16  ;;  %1780 = vrcp.f32 %v922_v42  ;;  %v1354_v33 = vand.u32 2147483648, %v919_v17  ;;  %v1399_v51 = vand.u32 2147483648, %v922_v42 }
 0x1fd   : > { %v1397_v5 = vand.u32 2147483647, %v922_v42  ;;  %vm1348_vm4 = vweird.f32 %v919_v17  ;;  %vm1393_vm7 = vweird.f32 %v922_v42  ;;  %vm1353_vm3 = vcmp.eq.f32.partialorder %v1352_v52, 8.507059e+37 }
 0x1fe   : > { %v1302_v25 = vadd.f32 %v1771_v26, %v1301_v53  ;;  %v1355_v12 = vor.u32 1.1754944e-38, %v1354_v33  ;;  %v1400_v48 = vor.u32 1.1754944e-38, %v1399_v51 }
 0x1ff   : > { %v1777_v50 = vpop.eup %1776  ;;  %vm1398_vm5 = vcmp.eq.f32.partialorder %v1397_v5, 8.507059e+37 }
 0x200   : > { %v1306_v58 = vsel %vm1305_vm15, %v1771_v26, %v1302_v25  ;;  %v1359_v29 = vmul.f32 %v1777_v50, %v920_v44  ;;  %vm1364_vm14 = vweird.f32 %v1777_v50 }
 0x201   : > { %v1311_v41 = vsel %vm1308_vm9, %v1310_v9, %v1306_v58  ;;  %v1779_v63 = vpop.eup %1778  ;;  %vm1365_vm10 = vmor %vm1363_vm8, %vm1364_vm14 }
 0x202   : > { %v1460_v62 = vsel %vm794_vm1, %v1311_v41, %v1428_v57  ;;  %v1360_v20 = vsub.f32 1.0, %v1359_v29  ;;  %v1781_v27 = vpop.eup %1780  ;;  %v1344_v2 = vmul.f32 %v1779_v63, %v919_v17  ;;  %vm1349_vm13 = vweird.f32 %v1779_v63 }
 0x203   : > { %1493 = vst.msk [vmem:[%s1865_s25 + $0xc8] sm:$0xff] %vm1467_vm0, %v1460_v62  ;;  %v1389_v36 = vmul.f32 %v1781_v27, %v922_v42  ;;  %vm1394_vm6 = vweird.f32 %v1781_v27  ;;  %vm1350_vm12 = vmor %vm1348_vm4, %vm1349_vm13 }
 0x204   : > { %v1361_v6 = vmul.f32 %v1777_v50, %v1360_v20  ;;  %v1345_v8 = vsub.f32 1.0, %v1344_v2  ;;  %vm1395_vm11 = vmor %vm1393_vm7, %vm1394_vm6 }
 0x205   : > { %v1390_v49 = vsub.f32 1.0, %v1389_v36 }
 0x206   : > { %v1362_v4 = vadd.f32 %v1777_v50, %v1361_v6  ;;  %v1346_v18 = vmul.f32 %v1779_v63, %v1345_v8 }
 0x207   : > { %v1391_v23 = vmul.f32 %v1781_v27, %v1390_v49 }
 0x208   : > { %v1366_v13 = vsel %vm1365_vm10, %v1777_v50, %v1362_v4  ;;  %v1347_v61 = vadd.f32 %v1779_v63, %v1346_v18 }
 0x209   : > { %v1371_v0 = vsel %vm1368_vm2, %v1370_v31, %v1366_v13  ;;  %v1392_v10 = vadd.f32 %v1781_v27, %v1391_v23 }
 0x20a   : > { %v1464_v60 = vsel %vm794_vm1, %v1371_v0, %v1432_v3  ;;  %v1351_v1 = vsel %vm1350_vm12, %v1779_v63, %v1347_v61 }
 0x20b   : > { %1497 = vst.msk [vmem:[%s1865_s25 + $0xe8] sm:$0xff] %vm1467_vm0, %v1464_v60  ;;  %v1356_v30 = vsel %vm1353_vm3, %v1355_v12, %v1351_v1  ;;  %v1396_v40 = vsel %vm1395_vm11, %v1781_v27, %v1392_v10 }
 0x20c   : > { %v1463_v37 = vsel %vm794_vm1, %v1356_v30, %v1431_v59  ;;  %v1401_v38 = vsel %vm1398_vm5, %v1400_v48, %v1396_v40 }
 0x20d   : > { %1496 = vst.msk [vmem:[%s1865_s25 + $0xe0] sm:$0xff] %vm1467_vm0, %v1463_v37  ;;  %v1466_v34 = vsel %vm794_vm1, %v1401_v38, %v1434_v43 }
 0x20e   : > { %1499 = vst.msk [vmem:[%s1865_s25 + $0xf8] sm:$0xff] %vm1467_vm0, %v1466_v34 }
 0x20f PF: > { %s21_s16 = sadd.s32 1, %s1812_s16  }
 0x210   : > { %p18_p6 = scmp.ge.s32.totalorder %s21_s16, 4  }
 0x212   :  { %20 = sbr.rel (!%p18_p6) target bundleno = 7 (0x7), region = 126 }
 0x217   :  { %1522 = vsyncmov [#allocation3] }
 0x21a   :  { %s1523_s9 = vpop.sfrf %1522 }
 0x21b   :  { %p1622_p7 = scmp.ne.s32.totalorder %s1523_s9, 0 }
 0x21d   :  { %1527 = shalt.err (%p1622_p7)  }

</bundles_post_ra>
